<compile_context>
chip_gen: v7x
topology: tpu7x:2x2x1
jax: 0.10.0
libtpu: 0.0.40
codegen_flags: <defaults>
</compile_context>

<pallas_src>
import functools

import jax
import jax.numpy as jnp
from jax import lax
from jax.experimental import pallas as pl
from jax.experimental.pallas import tpu as pltpu


# ----------------------------------------------------------------------------
# Pallas kernel
# ----------------------------------------------------------------------------
def _make_kernel(n_layer, hidden_dim, kp_dim, seq_len, batch_pad):
    H = hidden_dim
    KP = kp_dim
    S = seq_len
    Bp = batch_pad

    def kernel(*refs):
        # ---- inputs
        qa_ref, q_ref = refs[0], refs[1]                    # (S*Bp, qa_dim), (S*Bp, q_dim)
        w_ih0_ref, b0_ref, w_hh0_ref = refs[2], refs[3], refs[4]
        off = 5
        stk_refs = [(refs[off + 2 * i], refs[off + 2 * i + 1])
                    for i in range(n_layer - 1)]            # (2H,4H), (1,4H) per upper layer
        off2 = off + 2 * (n_layer - 1)
        w_ua_ref, b_ua_ref, w_kpd_ref, b_kpd_ref = refs[off2:off2 + 4]
        # ---- output / scratch
        out_ref = refs[off2 + 4]                            # (S*Bp, 1)
        xp_ref = refs[off2 + 5]                             # (S*Bp, 4H) scratch
        hall_ref = refs[off2 + 6]                           # (S*Bp, H)  scratch

        # ---- layer-0 input projection for ALL timesteps (one batched MXU call)
        xp_ref[...] = (jnp.dot(qa_ref[...], w_ih0_ref[...],
                               preferred_element_type=jnp.float32)
                       + b0_ref[...])

        # ---- hoist recurrent weights / biases out of the time loop
        w_hh0 = w_hh0_ref[...]                              # (H, 4H)
        stk_w = [w_ref[...] for (w_ref, _) in stk_refs]     # (2H, 4H)
        stk_b = [jnp.broadcast_to(b_ref[...], (Bp, 4 * H)) for (_, b_ref) in stk_refs]

        def lstm_cell(gates, c_prev):
            # full-vreg activations, sliced afterwards (PyTorch gate order i,f,g,o)
            sig = jax.nn.sigmoid(gates)
            tnh = jnp.tanh(gates)
            i_g = sig[:, 0:H]
            f_g = sig[:, H:2 * H]
            o_g = sig[:, 3 * H:4 * H]
            g_g = tnh[:, 2 * H:3 * H]
            c_new = f_g * c_prev + i_g * g_g
            h_new = o_g * jnp.tanh(c_new)
            return h_new, c_new

        def body(t, carry):
            hs, cs = carry
            row = t * Bp                                     # sublane-aligned (Bp == 8)
            # layer 0: input projection is precomputed, only h @ W_hh stays here
            gates0 = (xp_ref[pl.ds(row, Bp), :]
                      + jnp.dot(hs[0], w_hh0, preferred_element_type=jnp.float32))
            h_new, c_new = lstm_cell(gates0, cs[0])
            new_hs, new_cs = [h_new], [c_new]
            x = h_new
            # layers >= 1: fused [x, h_prev] @ [W_ih; W_hh]
            for l in range(1, n_layer):
                xcat = jnp.concatenate([x, hs[l]], axis=1)   # (Bp, 2H)
                gates = (jnp.dot(xcat, stk_w[l - 1],
                                 preferred_element_type=jnp.float32)
                         + stk_b[l - 1])
                h_l, c_l = lstm_cell(gates, cs[l])
                new_hs.append(h_l)
                new_cs.append(c_l)
                x = h_l
            hall_ref[pl.ds(row, Bp), :] = x                  # top-layer hidden state
            return (tuple(new_hs), tuple(new_cs))

        zeros = jnp.zeros((Bp, H), jnp.float32)
        init = (tuple(zeros for _ in range(n_layer)),
                tuple(zeros for _ in range(n_layer)))
        lax.fori_loop(0, S, body, init, unroll=True)

        # ---- batched IRT head over all S*Bp rows (hoisted out of recurrence)
        hall = hall_ref[...]                                 # (S*Bp, H)
        ua = (jnp.dot(hall, w_ua_ref[...], preferred_element_type=jnp.float32)
              + b_ua_ref[...])                               # (S*Bp, KP)
        kpd = (jnp.dot(q_ref[...], w_kpd_ref[...], preferred_element_type=jnp.float32)
               + b_kpd_ref[...])                             # (S*Bp, 2*KP)  [kp | diff]
        kp_logits = kpd[:, 0:KP]
        diff = kpd[:, KP:2 * KP]
        m = jnp.max(kp_logits, axis=1, keepdims=True)
        e = jnp.exp(kp_logits - m)
        p = e / jnp.sum(e, axis=1, keepdims=True)            # softmax over kp_dim
        logit = jnp.sum((ua - diff) * p, axis=1, keepdims=True)
        out_ref[...] = logit.astype(out_ref.dtype)           # single lane-contiguous store

    return kernel


# ----------------------------------------------------------------------------
# wrapper
# ----------------------------------------------------------------------------
@functools.partial(jax.jit, static_argnames=("n_layer", "hidden_dim"))
def deepirt_forward(q_idx, qa_idx, params, *, n_layer, hidden_dim):
    B, S = q_idx.shape
    kp_dim = params["w_kp"].shape[1]

    q_emb = params["q_table"][q_idx]                         # (B, S, q_dim)   glue gather
    qa_emb = params["qa_table"][qa_idx]                      # (B, S, qa_dim)  glue gather

    # (S, B, E) layout, pad batch to the f32 sublane multiple (8)
    Bp = ((B + 7) // 8) * 8
    pad = Bp - B
    q_sbe = jnp.transpose(q_emb, (1, 0, 2))
    qa_sbe = jnp.transpose(qa_emb, (1, 0, 2))
    if pad:
        q_sbe = jnp.pad(q_sbe, ((0, 0), (0, pad), (0, 0)))
        qa_sbe = jnp.pad(qa_sbe, ((0, 0), (0, pad), (0, 0)))
    q_flat = q_sbe.reshape(S * Bp, -1)                       # row = s*Bp + b
    qa_flat = qa_sbe.reshape(S * Bp, -1)

    # fused weights (stacked outside the kernel, computed once per call)
    w_kpd = jnp.concatenate([params["w_kp"], params["w_diff"]], axis=1)   # (q_dim, 2*kp)
    b_kpd = jnp.concatenate([params["b_kp"], params["b_diff"]], axis=1)   # (1, 2*kp)

    args = [qa_flat, q_flat,
            params["w_ih_0"], params["b_0"], params["w_hh_0"]]
    for l in range(1, n_layer):
        w_stk = jnp.concatenate([params[f"w_ih_{l}"], params[f"w_hh_{l}"]], axis=0)  # (2H,4H)
        args += [w_stk, params[f"b_{l}"]]
    args += [params["w_ua"], params["b_ua"], w_kpd, b_kpd]

    def full_spec(arr):
        nd = arr.ndim
        return pl.BlockSpec(arr.shape, lambda i, _nd=nd: (0,) * _nd)

    out = pl.pallas_call(
        _make_kernel(n_layer, hidden_dim, kp_dim, S, Bp),
        out_shape=jax.ShapeDtypeStruct((S * Bp, 1), jnp.float32),
        grid_spec=pltpu.PrefetchScalarGridSpec(
            num_scalar_prefetch=0,
            grid=(1,),
            in_specs=[full_spec(a) for a in args],
            out_specs=pl.BlockSpec((S * Bp, 1), lambda i: (0, 0)),
            scratch_shapes=[pltpu.VMEM((S * Bp, 4 * hidden_dim), jnp.float32),
                            pltpu.VMEM((S * Bp, hidden_dim), jnp.float32)],
        ),
        compiler_params=pltpu.CompilerParams(dimension_semantics=("arbitrary",)),
    )(*args)

    # rows are ordered s*Bp + b; drop padding, reorder to PyTorch's b*S + s flatten
    out_sb = out.reshape(S, Bp)[:, :B]                       # (S, B)
    return jnp.transpose(out_sb).reshape(B * S), None


# ----------------------------------------------------------------------------
# pure-JAX reference (for verification)
# ----------------------------------------------------------------------------
def deepirt_reference(q_idx, qa_idx, params, *, n_layer, hidden_dim):
    HP = lax.Precision.HIGHEST
    B, S = q_idx.shape
    H = hidden_dim
    q_emb = params["q_table"][q_idx]
    qa_emb = params["qa_table"][qa_idx]

    x = jnp.transpose(qa_emb, (1, 0, 2))                     # (S, B, E)
    for l in range(n_layer):
        w_ih, w_hh, b = params[f"w_ih_{l}"], params[f"w_hh_{l}"], params[f"b_{l}"][0]

        def step(carry, xt):
            h, c = carry
            gates = (jnp.dot(xt, w_ih, precision=HP)
                     + jnp.dot(h, w_hh, precision=HP) + b)
            i_g = jax.nn.sigmoid(gates[:, 0:H])
            f_g = jax.nn.sigmoid(gates[:, H:2 * H])
            g_g = jnp.tanh(gates[:, 2 * H:3 * H])
            o_g = jax.nn.sigmoid(gates[:, 3 * H:4 * H])
            c_new = f_g * c + i_g * g_g
            h_new = o_g * jnp.tanh(c_new)
            return (h_new, c_new), h_new

        init = (jnp.zeros((B, H), jnp.float32), jnp.zeros((B, H), jnp.float32))
        _, hs = lax.scan(step, init, x)                      # (S, B, H)
        x = hs

    states = jnp.transpose(x, (1, 0, 2)).reshape(B * S, H)   # (B*S, H)
    qe = q_emb.reshape(B * S, -1)
    ua = jnp.dot(states, params["w_ua"], precision=HP) + params["b_ua"][0]
    kp = jax.nn.softmax(jnp.dot(qe, params["w_kp"], precision=HP) + params["b_kp"][0], axis=1)
    diff = jnp.dot(qe, params["w_diff"], precision=HP) + params["b_diff"][0]
    return ((ua - diff) * kp).sum(axis=1)


# ----------------------------------------------------------------------------
# deterministic parameter init + demo
# ----------------------------------------------------------------------------
def init_params(key, n_skill, q_embed_dim, qa_embed_dim, hidden_dim, kp_dim, n_layer):
    keys = jax.random.split(key, 32)
    ki = iter(keys)
    p = {}
    q_table = 0.1 * jax.random.normal(next(ki), (n_skill + 1, q_embed_dim), jnp.float32)
    p["q_table"] = q_table.at[n_skill].set(0.0)              # padding_idx row
    qa_table = 0.1 * jax.random.normal(next(ki), (2 * n_skill + 1, qa_embed_dim), jnp.float32)
    p["qa_table"] = qa_table.at[2 * n_skill].set(0.0)        # padding_idx row
    for l in range(n_layer):
        in_dim = qa_embed_dim if l == 0 else hidden_dim
        p[f"w_ih_{l}"] = 0.1 * jax.random.normal(next(ki), (in_dim, 4 * hidden_dim), jnp.float32)
        p[f"w_hh_{l}"] = 0.1 * jax.random.normal(next(ki), (hidden_dim, 4 * hidden_dim), jnp.float32)
        p[f"b_{l}"] = 0.1 * jax.random.normal(next(ki), (1, 4 * hidden_dim), jnp.float32)  # b_ih+b_hh
    p["w_ua"] = 0.1 * jax.random.normal(next(ki), (hidden_dim, kp_dim), jnp.float32)
    p["b_ua"] = 0.1 * jax.random.normal(next(ki), (1, kp_dim), jnp.float32)
    p["w_kp"] = 0.1 * jax.random.normal(next(ki), (q_embed_dim, kp_dim), jnp.float32)
    p["b_kp"] = 0.1 * jax.random.normal(next(ki), (1, kp_dim), jnp.float32)
    p["w_diff"] = 0.1 * jax.random.normal(next(ki), (q_embed_dim, kp_dim), jnp.float32)
    p["b_diff"] = 0.1 * jax.random.normal(next(ki), (1, kp_dim), jnp.float32)
    return p


if __name__ == "__main__":
    # small shapes implied by the module
    n_skill, q_embed_dim, qa_embed_dim = 16, 16, 16
    hidden_dim, kp_dim, n_layer = 32, 16, 2
    B, S = 2, 8

    key = jax.random.PRNGKey(0)
    kp_, kq_, kqa_ = jax.random.split(key, 3)
    params = init_params(kp_, n_skill, q_embed_dim, qa_embed_dim, hidden_dim, kp_dim, n_layer)
    q_idx = jax.random.randint(kq_, (B, S), 0, n_skill, dtype=jnp.int32)
    qa_idx = jax.random.randint(kqa_, (B, S), 0, 2 * n_skill, dtype=jnp.int32)

    logits, aux = deepirt_forward(q_idx, qa_idx, params, n_layer=n_layer, hidden_dim=hidden_dim)
    logits = jax.block_until_ready(logits)
    assert logits.shape == (B * S,) and aux is None

    ref = jax.block_until_ready(
        deepirt_reference(q_idx, qa_idx, params, n_layer=n_layer, hidden_dim=hidden_dim))
    assert jnp.allclose(logits, ref, rtol=2e-3, atol=2e-3), (logits, ref)

    print("KERNEL_OK")
</pallas_src>

<mosaic_0001>
module attributes {stable_mosaic.version = 11 : i64} {
  func.func @kernel(%arg0: i32, %arg1: memref<64x16xf32, #tpu.memory_space<vmem>>, %arg2: memref<64x16xf32, #tpu.memory_space<vmem>>, %arg3: memref<16x128xf32, #tpu.memory_space<vmem>>, %arg4: memref<1x128xf32, #tpu.memory_space<vmem>>, %arg5: memref<32x128xf32, #tpu.memory_space<vmem>>, %arg6: memref<64x128xf32, #tpu.memory_space<vmem>>, %arg7: memref<1x128xf32, #tpu.memory_space<vmem>>, %arg8: memref<32x16xf32, #tpu.memory_space<vmem>>, %arg9: memref<1x16xf32, #tpu.memory_space<vmem>>, %arg10: memref<16x32xf32, #tpu.memory_space<vmem>>, %arg11: memref<1x32xf32, #tpu.memory_space<vmem>>, %arg12: memref<64x1xf32, #tpu.memory_space<vmem>>, %arg13: memref<64x128xf32, #tpu.memory_space<vmem>>, %arg14: memref<64x32xf32, #tpu.memory_space<vmem>>) attributes {dimension_semantics = [#tpu.dimension_semantics<arbitrary>], iteration_bounds = array<i64: 1>, scalar_prefetch = 0 : i64, scratch_operands = 2 : i64, tpu.core_type = #tpu.core_type<tc>, window_params = [{pipeline_mode = #tpu.pipeline_mode<synchronous>, transform_indices = @transform_0, window_bounds = array<i64: 64, 16>}, {pipeline_mode = #tpu.pipeline_mode<synchronous>, transform_indices = @transform_1, window_bounds = array<i64: 64, 16>}, {pipeline_mode = #tpu.pipeline_mode<synchronous>, transform_indices = @transform_2, window_bounds = array<i64: 16, 128>}, {pipeline_mode = #tpu.pipeline_mode<synchronous>, transform_indices = @transform_3, window_bounds = array<i64: 1, 128>}, {pipeline_mode = #tpu.pipeline_mode<synchronous>, transform_indices = @transform_4, window_bounds = array<i64: 32, 128>}, {pipeline_mode = #tpu.pipeline_mode<synchronous>, transform_indices = @transform_5, window_bounds = array<i64: 64, 128>}, {pipeline_mode = #tpu.pipeline_mode<synchronous>, transform_indices = @transform_6, window_bounds = array<i64: 1, 128>}, {pipeline_mode = #tpu.pipeline_mode<synchronous>, transform_indices = @transform_7, window_bounds = array<i64: 32, 16>}, {pipeline_mode = #tpu.pipeline_mode<synchronous>, transform_indices = @transform_8, window_bounds = array<i64: 1, 16>}, {pipeline_mode = #tpu.pipeline_mode<synchronous>, transform_indices = @transform_9, window_bounds = array<i64: 16, 32>}, {pipeline_mode = #tpu.pipeline_mode<synchronous>, transform_indices = @transform_10, window_bounds = array<i64: 1, 32>}, {pipeline_mode = #tpu.pipeline_mode<synchronous>, transform_indices = @transform_11, window_bounds = array<i64: 64, 1>}]} {
    %c0 = arith.constant 0 : index
    %c0_0 = arith.constant 0 : index
    %0 = vector.load %arg1[%c0, %c0_0] : memref<64x16xf32, #tpu.memory_space<vmem>>, vector<64x16xf32>
    %c0_1 = arith.constant 0 : index
    %c0_2 = arith.constant 0 : index
    %1 = vector.load %arg3[%c0_1, %c0_2] : memref<16x128xf32, #tpu.memory_space<vmem>>, vector<16x128xf32>
    %cst = arith.constant dense<0.000000e+00> : vector<64x128xf32>
    %2 = tpu.matmul %0, %1, %cst {dimension_numbers = #tpu.dot_dimension_numbers<[1], [0], [0], [1], [0, 0, 1, 1], [], []>} : vector<64x16xf32>, vector<16x128xf32>, vector<64x128xf32> -> vector<64x128xf32>
    %c0_3 = arith.constant 0 : index
    %c0_4 = arith.constant 0 : index
    %3 = vector.load %arg4[%c0_3, %c0_4] : memref<1x128xf32, #tpu.memory_space<vmem>>, vector<1x128xf32>
    %4 = vector.broadcast %3 : vector<1x128xf32> to vector<64x128xf32>
    %5 = arith.addf %2, %4 : vector<64x128xf32>
    %c0_5 = arith.constant 0 : index
    %c0_6 = arith.constant 0 : index
    %6 = vector.load %arg13[%c0_5, %c0_6] : memref<64x128xf32, #tpu.memory_space<vmem>>, vector<64x128xf32>
    tpu.vector_store %arg13[%c0_5, %c0_6], %5 {strides = array<i32>} : memref<64x128xf32, #tpu.memory_space<vmem>>, vector<64x128xf32>,
    %c0_7 = arith.constant 0 : index
    %c0_8 = arith.constant 0 : index
    %7 = vector.load %arg5[%c0_7, %c0_8] : memref<32x128xf32, #tpu.memory_space<vmem>>, vector<32x128xf32>
    %c0_9 = arith.constant 0 : index
    %c0_10 = arith.constant 0 : index
    %8 = vector.load %arg6[%c0_9, %c0_10] : memref<64x128xf32, #tpu.memory_space<vmem>>, vector<64x128xf32>
    %c0_11 = arith.constant 0 : index
    %c0_12 = arith.constant 0 : index
    %9 = vector.load %arg7[%c0_11, %c0_12] : memref<1x128xf32, #tpu.memory_space<vmem>>, vector<1x128xf32>
    %10 = vector.shape_cast %9 : vector<1x128xf32> to vector<1x128xf32>
    %11 = vector.broadcast %10 : vector<1x128xf32> to vector<8x128xf32>
    %cst_13 = arith.constant 0.000000e+00 : f32
    %12 = vector.broadcast %cst_13 : f32 to vector<8x32xf32>
    %c0_i32 = arith.constant 0 : i32
    %c8_i32 = arith.constant 8 : i32
    %13 = arith.muli %c0_i32, %c8_i32 : i32
    %14 = arith.index_cast %13 : i32 to index
    %c0_14 = arith.constant 0 : index
    %15 = vector.load %arg13[%14, %c0_14] : memref<64x128xf32, #tpu.memory_space<vmem>>, vector<8x128xf32>
    %cst_15 = arith.constant dense<0.000000e+00> : vector<8x128xf32>
    %16 = tpu.matmul %12, %7, %cst_15 {dimension_numbers = #tpu.dot_dimension_numbers<[1], [0], [0], [1], [0, 0, 1, 1], [], []>} : vector<8x32xf32>, vector<32x128xf32>, vector<8x128xf32> -> vector<8x128xf32>
    %17 = arith.addf %15, %16 : vector<8x128xf32>
    %18 = arith.negf %17 : vector<8x128xf32>
    %19 = math.exp %18 : vector<8x128xf32>
    %cst_16 = arith.constant 1.000000e+00 : f32
    %20 = vector.broadcast %cst_16 : f32 to vector<8x128xf32>
    %21 = arith.addf %20, %19 : vector<8x128xf32>
    %22 = arith.divf %20, %21 : vector<8x128xf32>
    %23 = math.tanh %17 : vector<8x128xf32>
    %24 = vector.extract_strided_slice %22 {offsets = [0, 0], sizes = [8, 32], strides = [1, 1]} : vector<8x128xf32> to vector<8x32xf32>
    %25 = vector.extract_strided_slice %22 {offsets = [0, 32], sizes = [8, 32], strides = [1, 1]} : vector<8x128xf32> to vector<8x32xf32>
    %26 = vector.extract_strided_slice %22 {offsets = [0, 96], sizes = [8, 32], strides = [1, 1]} : vector<8x128xf32> to vector<8x32xf32>
    %27 = vector.extract_strided_slice %23 {offsets = [0, 64], sizes = [8, 32], strides = [1, 1]} : vector<8x128xf32> to vector<8x32xf32>
    %28 = arith.mulf %25, %12 : vector<8x32xf32>
    %29 = arith.mulf %24, %27 : vector<8x32xf32>
    %30 = arith.addf %28, %29 : vector<8x32xf32>
    %31 = math.tanh %30 : vector<8x32xf32>
    %32 = arith.mulf %26, %31 : vector<8x32xf32>
    %33 = tpu.concatenate %32, %12 in 1 : vector<8x32xf32>, vector<8x32xf32> -> vector<8x64xf32>
    %cst_17 = arith.constant dense<0.000000e+00> : vector<8x128xf32>
    %34 = tpu.matmul %33, %8, %cst_17 {dimension_numbers = #tpu.dot_dimension_numbers<[1], [0], [0], [1], [0, 0, 1, 1], [], []>} : vector<8x64xf32>, vector<64x128xf32>, vector<8x128xf32> -> vector<8x128xf32>
    %35 = arith.addf %34, %11 : vector<8x128xf32>
    %36 = arith.negf %35 : vector<8x128xf32>
    %37 = math.exp %36 : vector<8x128xf32>
    %cst_18 = arith.constant 1.000000e+00 : f32
    %38 = vector.broadcast %cst_18 : f32 to vector<8x128xf32>
    %39 = arith.addf %38, %37 : vector<8x128xf32>
    %40 = arith.divf %38, %39 : vector<8x128xf32>
    %41 = math.tanh %35 : vector<8x128xf32>
    %42 = vector.extract_strided_slice %40 {offsets = [0, 0], sizes = [8, 32], strides = [1, 1]} : vector<8x128xf32> to vector<8x32xf32>
    %43 = vector.extract_strided_slice %40 {offsets = [0, 32], sizes = [8, 32], strides = [1, 1]} : vector<8x128xf32> to vector<8x32xf32>
    %44 = vector.extract_strided_slice %40 {offsets = [0, 96], sizes = [8, 32], strides = [1, 1]} : vector<8x128xf32> to vector<8x32xf32>
    %45 = vector.extract_strided_slice %41 {offsets = [0, 64], sizes = [8, 32], strides = [1, 1]} : vector<8x128xf32> to vector<8x32xf32>
    %46 = arith.mulf %43, %12 : vector<8x32xf32>
    %47 = arith.mulf %42, %45 : vector<8x32xf32>
    %48 = arith.addf %46, %47 : vector<8x32xf32>
    %49 = math.tanh %48 : vector<8x32xf32>
    %50 = arith.mulf %44, %49 : vector<8x32xf32>
    %51 = arith.index_cast %13 : i32 to index
    %c0_19 = arith.constant 0 : index
    %52 = vector.load %arg14[%51, %c0_19] : memref<64x32xf32, #tpu.memory_space<vmem>>, vector<8x32xf32>
    tpu.vector_store %arg14[%51, %c0_19], %50 {strides = array<i32>} : memref<64x32xf32, #tpu.memory_space<vmem>>, vector<8x32xf32>,
    %c1_i32 = arith.constant 1 : i32
    %c8_i32_20 = arith.constant 8 : i32
    %53 = arith.muli %c1_i32, %c8_i32_20 : i32
    %54 = arith.index_cast %53 : i32 to index
    %c0_21 = arith.constant 0 : index
    %55 = vector.load %arg13[%54, %c0_21] : memref<64x128xf32, #tpu.memory_space<vmem>>, vector<8x128xf32>
    %cst_22 = arith.constant dense<0.000000e+00> : vector<8x128xf32>
    %56 = tpu.matmul %32, %7, %cst_22 {dimension_numbers = #tpu.dot_dimension_numbers<[1], [0], [0], [1], [0, 0, 1, 1], [], []>} : vector<8x32xf32>, vector<32x128xf32>, vector<8x128xf32> -> vector<8x128xf32>
    %57 = arith.addf %55, %56 : vector<8x128xf32>
    %58 = arith.negf %57 : vector<8x128xf32>
    %59 = math.exp %58 : vector<8x128xf32>
    %cst_23 = arith.constant 1.000000e+00 : f32
    %60 = vector.broadcast %cst_23 : f32 to vector<8x128xf32>
    %61 = arith.addf %60, %59 : vector<8x128xf32>
    %62 = arith.divf %60, %61 : vector<8x128xf32>
    %63 = math.tanh %57 : vector<8x128xf32>
    %64 = vector.extract_strided_slice %62 {offsets = [0, 0], sizes = [8, 32], strides = [1, 1]} : vector<8x128xf32> to vector<8x32xf32>
    %65 = vector.extract_strided_slice %62 {offsets = [0, 32], sizes = [8, 32], strides = [1, 1]} : vector<8x128xf32> to vector<8x32xf32>
    %66 = vector.extract_strided_slice %62 {offsets = [0, 96], sizes = [8, 32], strides = [1, 1]} : vector<8x128xf32> to vector<8x32xf32>
    %67 = vector.extract_strided_slice %63 {offsets = [0, 64], sizes = [8, 32], strides = [1, 1]} : vector<8x128xf32> to vector<8x32xf32>
    %68 = arith.mulf %65, %30 : vector<8x32xf32>
    %69 = arith.mulf %64, %67 : vector<8x32xf32>
    %70 = arith.addf %68, %69 : vector<8x32xf32>
    %71 = math.tanh %70 : vector<8x32xf32>
    %72 = arith.mulf %66, %71 : vector<8x32xf32>
    %73 = tpu.concatenate %72, %50 in 1 : vector<8x32xf32>, vector<8x32xf32> -> vector<8x64xf32>
    %cst_24 = arith.constant dense<0.000000e+00> : vector<8x128xf32>
    %74 = tpu.matmul %73, %8, %cst_24 {dimension_numbers = #tpu.dot_dimension_numbers<[1], [0], [0], [1], [0, 0, 1, 1], [], []>} : vector<8x64xf32>, vector<64x128xf32>, vector<8x128xf32> -> vector<8x128xf32>
    %75 = arith.addf %74, %11 : vector<8x128xf32>
    %76 = arith.negf %75 : vector<8x128xf32>
    %77 = math.exp %76 : vector<8x128xf32>
    %cst_25 = arith.constant 1.000000e+00 : f32
    %78 = vector.broadcast %cst_25 : f32 to vector<8x128xf32>
    %79 = arith.addf %78, %77 : vector<8x128xf32>
    %80 = arith.divf %78, %79 : vector<8x128xf32>
    %81 = math.tanh %75 : vector<8x128xf32>
    %82 = vector.extract_strided_slice %80 {offsets = [0, 0], sizes = [8, 32], strides = [1, 1]} : vector<8x128xf32> to vector<8x32xf32>
    %83 = vector.extract_strided_slice %80 {offsets = [0, 32], sizes = [8, 32], strides = [1, 1]} : vector<8x128xf32> to vector<8x32xf32>
    %84 = vector.extract_strided_slice %80 {offsets = [0, 96], sizes = [8, 32], strides = [1, 1]} : vector<8x128xf32> to vector<8x32xf32>
    %85 = vector.extract_strided_slice %81 {offsets = [0, 64], sizes = [8, 32], strides = [1, 1]} : vector<8x128xf32> to vector<8x32xf32>
    %86 = arith.mulf %83, %48 : vector<8x32xf32>
    %87 = arith.mulf %82, %85 : vector<8x32xf32>
    %88 = arith.addf %86, %87 : vector<8x32xf32>
    %89 = math.tanh %88 : vector<8x32xf32>
    %90 = arith.mulf %84, %89 : vector<8x32xf32>
    %91 = arith.index_cast %53 : i32 to index
    %c0_26 = arith.constant 0 : index
    %92 = vector.load %arg14[%91, %c0_26] : memref<64x32xf32, #tpu.memory_space<vmem>>, vector<8x32xf32>
    tpu.vector_store %arg14[%91, %c0_26], %90 {strides = array<i32>} : memref<64x32xf32, #tpu.memory_space<vmem>>, vector<8x32xf32>,
    %c2_i32 = arith.constant 2 : i32
    %c8_i32_27 = arith.constant 8 : i32
    %93 = arith.muli %c2_i32, %c8_i32_27 : i32
    %94 = arith.index_cast %93 : i32 to index
    %c0_28 = arith.constant 0 : index
    %95 = vector.load %arg13[%94, %c0_28] : memref<64x128xf32, #tpu.memory_space<vmem>>, vector<8x128xf32>
    %cst_29 = arith.constant dense<0.000000e+00> : vector<8x128xf32>
    %96 = tpu.matmul %72, %7, %cst_29 {dimension_numbers = #tpu.dot_dimension_numbers<[1], [0], [0], [1], [0, 0, 1, 1], [], []>} : vector<8x32xf32>, vector<32x128xf32>, vector<8x128xf32> -> vector<8x128xf32>
    %97 = arith.addf %95, %96 : vector<8x128xf32>
    %98 = arith.negf %97 : vector<8x128xf32>
    %99 = math.exp %98 : vector<8x128xf32>
    %cst_30 = arith.constant 1.000000e+00 : f32
    %100 = vector.broadcast %cst_30 : f32 to vector<8x128xf32>
    %101 = arith.addf %100, %99 : vector<8x128xf32>
    %102 = arith.divf %100, %101 : vector<8x128xf32>
    %103 = math.tanh %97 : vector<8x128xf32>
    %104 = vector.extract_strided_slice %102 {offsets = [0, 0], sizes = [8, 32], strides = [1, 1]} : vector<8x128xf32> to vector<8x32xf32>
    %105 = vector.extract_strided_slice %102 {offsets = [0, 32], sizes = [8, 32], strides = [1, 1]} : vector<8x128xf32> to vector<8x32xf32>
    %106 = vector.extract_strided_slice %102 {offsets = [0, 96], sizes = [8, 32], strides = [1, 1]} : vector<8x128xf32> to vector<8x32xf32>
    %107 = vector.extract_strided_slice %103 {offsets = [0, 64], sizes = [8, 32], strides = [1, 1]} : vector<8x128xf32> to vector<8x32xf32>
    %108 = arith.mulf %105, %70 : vector<8x32xf32>
    %109 = arith.mulf %104, %107 : vector<8x32xf32>
    %110 = arith.addf %108, %109 : vector<8x32xf32>
    %111 = math.tanh %110 : vector<8x32xf32>
    %112 = arith.mulf %106, %111 : vector<8x32xf32>
    %113 = tpu.concatenate %112, %90 in 1 : vector<8x32xf32>, vector<8x32xf32> -> vector<8x64xf32>
    %cst_31 = arith.constant dense<0.000000e+00> : vector<8x128xf32>
    %114 = tpu.matmul %113, %8, %cst_31 {dimension_numbers = #tpu.dot_dimension_numbers<[1], [0], [0], [1], [0, 0, 1, 1], [], []>} : vector<8x64xf32>, vector<64x128xf32>, vector<8x128xf32> -> vector<8x128xf32>
    %115 = arith.addf %114, %11 : vector<8x128xf32>
    %116 = arith.negf %115 : vector<8x128xf32>
    %117 = math.exp %116 : vector<8x128xf32>
    %cst_32 = arith.constant 1.000000e+00 : f32
    %118 = vector.broadcast %cst_32 : f32 to vector<8x128xf32>
    %119 = arith.addf %118, %117 : vector<8x128xf32>
    %120 = arith.divf %118, %119 : vector<8x128xf32>
    %121 = math.tanh %115 : vector<8x128xf32>
    %122 = vector.extract_strided_slice %120 {offsets = [0, 0], sizes = [8, 32], strides = [1, 1]} : vector<8x128xf32> to vector<8x32xf32>
    %123 = vector.extract_strided_slice %120 {offsets = [0, 32], sizes = [8, 32], strides = [1, 1]} : vector<8x128xf32> to vector<8x32xf32>
    %124 = vector.extract_strided_slice %120 {offsets = [0, 96], sizes = [8, 32], strides = [1, 1]} : vector<8x128xf32> to vector<8x32xf32>
    %125 = vector.extract_strided_slice %121 {offsets = [0, 64], sizes = [8, 32], strides = [1, 1]} : vector<8x128xf32> to vector<8x32xf32>
    %126 = arith.mulf %123, %88 : vector<8x32xf32>
    %127 = arith.mulf %122, %125 : vector<8x32xf32>
    %128 = arith.addf %126, %127 : vector<8x32xf32>
    %129 = math.tanh %128 : vector<8x32xf32>
    %130 = arith.mulf %124, %129 : vector<8x32xf32>
    %131 = arith.index_cast %93 : i32 to index
    %c0_33 = arith.constant 0 : index
    %132 = vector.load %arg14[%131, %c0_33] : memref<64x32xf32, #tpu.memory_space<vmem>>, vector<8x32xf32>
    tpu.vector_store %arg14[%131, %c0_33], %130 {strides = array<i32>} : memref<64x32xf32, #tpu.memory_space<vmem>>, vector<8x32xf32>,
    %c3_i32 = arith.constant 3 : i32
    %c8_i32_34 = arith.constant 8 : i32
    %133 = arith.muli %c3_i32, %c8_i32_34 : i32
    %134 = arith.index_cast %133 : i32 to index
    %c0_35 = arith.constant 0 : index
    %135 = vector.load %arg13[%134, %c0_35] : memref<64x128xf32, #tpu.memory_space<vmem>>, vector<8x128xf32>
    %cst_36 = arith.constant dense<0.000000e+00> : vector<8x128xf32>
    %136 = tpu.matmul %112, %7, %cst_36 {dimension_numbers = #tpu.dot_dimension_numbers<[1], [0], [0], [1], [0, 0, 1, 1], [], []>} : vector<8x32xf32>, vector<32x128xf32>, vector<8x128xf32> -> vector<8x128xf32>
    %137 = arith.addf %135, %136 : vector<8x128xf32>
    %138 = arith.negf %137 : vector<8x128xf32>
    %139 = math.exp %138 : vector<8x128xf32>
    %cst_37 = arith.constant 1.000000e+00 : f32
    %140 = vector.broadcast %cst_37 : f32 to vector<8x128xf32>
    %141 = arith.addf %140, %139 : vector<8x128xf32>
    %142 = arith.divf %140, %141 : vector<8x128xf32>
    %143 = math.tanh %137 : vector<8x128xf32>
    %144 = vector.extract_strided_slice %142 {offsets = [0, 0], sizes = [8, 32], strides = [1, 1]} : vector<8x128xf32> to vector<8x32xf32>
    %145 = vector.extract_strided_slice %142 {offsets = [0, 32], sizes = [8, 32], strides = [1, 1]} : vector<8x128xf32> to vector<8x32xf32>
    %146 = vector.extract_strided_slice %142 {offsets = [0, 96], sizes = [8, 32], strides = [1, 1]} : vector<8x128xf32> to vector<8x32xf32>
    %147 = vector.extract_strided_slice %143 {offsets = [0, 64], sizes = [8, 32], strides = [1, 1]} : vector<8x128xf32> to vector<8x32xf32>
    %148 = arith.mulf %145, %110 : vector<8x32xf32>
    %149 = arith.mulf %144, %147 : vector<8x32xf32>
    %150 = arith.addf %148, %149 : vector<8x32xf32>
    %151 = math.tanh %150 : vector<8x32xf32>
    %152 = arith.mulf %146, %151 : vector<8x32xf32>
    %153 = tpu.concatenate %152, %130 in 1 : vector<8x32xf32>, vector<8x32xf32> -> vector<8x64xf32>
    %cst_38 = arith.constant dense<0.000000e+00> : vector<8x128xf32>
    %154 = tpu.matmul %153, %8, %cst_38 {dimension_numbers = #tpu.dot_dimension_numbers<[1], [0], [0], [1], [0, 0, 1, 1], [], []>} : vector<8x64xf32>, vector<64x128xf32>, vector<8x128xf32> -> vector<8x128xf32>
    %155 = arith.addf %154, %11 : vector<8x128xf32>
    %156 = arith.negf %155 : vector<8x128xf32>
    %157 = math.exp %156 : vector<8x128xf32>
    %cst_39 = arith.constant 1.000000e+00 : f32
    %158 = vector.broadcast %cst_39 : f32 to vector<8x128xf32>
    %159 = arith.addf %158, %157 : vector<8x128xf32>
    %160 = arith.divf %158, %159 : vector<8x128xf32>
    %161 = math.tanh %155 : vector<8x128xf32>
    %162 = vector.extract_strided_slice %160 {offsets = [0, 0], sizes = [8, 32], strides = [1, 1]} : vector<8x128xf32> to vector<8x32xf32>
    %163 = vector.extract_strided_slice %160 {offsets = [0, 32], sizes = [8, 32], strides = [1, 1]} : vector<8x128xf32> to vector<8x32xf32>
    %164 = vector.extract_strided_slice %160 {offsets = [0, 96], sizes = [8, 32], strides = [1, 1]} : vector<8x128xf32> to vector<8x32xf32>
    %165 = vector.extract_strided_slice %161 {offsets = [0, 64], sizes = [8, 32], strides = [1, 1]} : vector<8x128xf32> to vector<8x32xf32>
    %166 = arith.mulf %163, %128 : vector<8x32xf32>
    %167 = arith.mulf %162, %165 : vector<8x32xf32>
    %168 = arith.addf %166, %167 : vector<8x32xf32>
    %169 = math.tanh %168 : vector<8x32xf32>
    %170 = arith.mulf %164, %169 : vector<8x32xf32>
    %171 = arith.index_cast %133 : i32 to index
    %c0_40 = arith.constant 0 : index
    %172 = vector.load %arg14[%171, %c0_40] : memref<64x32xf32, #tpu.memory_space<vmem>>, vector<8x32xf32>
    tpu.vector_store %arg14[%171, %c0_40], %170 {strides = array<i32>} : memref<64x32xf32, #tpu.memory_space<vmem>>, vector<8x32xf32>,
    %c4_i32 = arith.constant 4 : i32
    %c8_i32_41 = arith.constant 8 : i32
    %173 = arith.muli %c4_i32, %c8_i32_41 : i32
    %174 = arith.index_cast %173 : i32 to index
    %c0_42 = arith.constant 0 : index
    %175 = vector.load %arg13[%174, %c0_42] : memref<64x128xf32, #tpu.memory_space<vmem>>, vector<8x128xf32>
    %cst_43 = arith.constant dense<0.000000e+00> : vector<8x128xf32>
    %176 = tpu.matmul %152, %7, %cst_43 {dimension_numbers = #tpu.dot_dimension_numbers<[1], [0], [0], [1], [0, 0, 1, 1], [], []>} : vector<8x32xf32>, vector<32x128xf32>, vector<8x128xf32> -> vector<8x128xf32>
    %177 = arith.addf %175, %176 : vector<8x128xf32>
    %178 = arith.negf %177 : vector<8x128xf32>
    %179 = math.exp %178 : vector<8x128xf32>
    %cst_44 = arith.constant 1.000000e+00 : f32
    %180 = vector.broadcast %cst_44 : f32 to vector<8x128xf32>
    %181 = arith.addf %180, %179 : vector<8x128xf32>
    %182 = arith.divf %180, %181 : vector<8x128xf32>
    %183 = math.tanh %177 : vector<8x128xf32>
    %184 = vector.extract_strided_slice %182 {offsets = [0, 0], sizes = [8, 32], strides = [1, 1]} : vector<8x128xf32> to vector<8x32xf32>
    %185 = vector.extract_strided_slice %182 {offsets = [0, 32], sizes = [8, 32], strides = [1, 1]} : vector<8x128xf32> to vector<8x32xf32>
    %186 = vector.extract_strided_slice %182 {offsets = [0, 96], sizes = [8, 32], strides = [1, 1]} : vector<8x128xf32> to vector<8x32xf32>
    %187 = vector.extract_strided_slice %183 {offsets = [0, 64], sizes = [8, 32], strides = [1, 1]} : vector<8x128xf32> to vector<8x32xf32>
    %188 = arith.mulf %185, %150 : vector<8x32xf32>
    %189 = arith.mulf %184, %187 : vector<8x32xf32>
    %190 = arith.addf %188, %189 : vector<8x32xf32>
    %191 = math.tanh %190 : vector<8x32xf32>
    %192 = arith.mulf %186, %191 : vector<8x32xf32>
    %193 = tpu.concatenate %192, %170 in 1 : vector<8x32xf32>, vector<8x32xf32> -> vector<8x64xf32>
    %cst_45 = arith.constant dense<0.000000e+00> : vector<8x128xf32>
    %194 = tpu.matmul %193, %8, %cst_45 {dimension_numbers = #tpu.dot_dimension_numbers<[1], [0], [0], [1], [0, 0, 1, 1], [], []>} : vector<8x64xf32>, vector<64x128xf32>, vector<8x128xf32> -> vector<8x128xf32>
    %195 = arith.addf %194, %11 : vector<8x128xf32>
    %196 = arith.negf %195 : vector<8x128xf32>
    %197 = math.exp %196 : vector<8x128xf32>
    %cst_46 = arith.constant 1.000000e+00 : f32
    %198 = vector.broadcast %cst_46 : f32 to vector<8x128xf32>
    %199 = arith.addf %198, %197 : vector<8x128xf32>
    %200 = arith.divf %198, %199 : vector<8x128xf32>
    %201 = math.tanh %195 : vector<8x128xf32>
    %202 = vector.extract_strided_slice %200 {offsets = [0, 0], sizes = [8, 32], strides = [1, 1]} : vector<8x128xf32> to vector<8x32xf32>
    %203 = vector.extract_strided_slice %200 {offsets = [0, 32], sizes = [8, 32], strides = [1, 1]} : vector<8x128xf32> to vector<8x32xf32>
    %204 = vector.extract_strided_slice %200 {offsets = [0, 96], sizes = [8, 32], strides = [1, 1]} : vector<8x128xf32> to vector<8x32xf32>
    %205 = vector.extract_strided_slice %201 {offsets = [0, 64], sizes = [8, 32], strides = [1, 1]} : vector<8x128xf32> to vector<8x32xf32>
    %206 = arith.mulf %203, %168 : vector<8x32xf32>
    %207 = arith.mulf %202, %205 : vector<8x32xf32>
    %208 = arith.addf %206, %207 : vector<8x32xf32>
    %209 = math.tanh %208 : vector<8x32xf32>
    %210 = arith.mulf %204, %209 : vector<8x32xf32>
    %211 = arith.index_cast %173 : i32 to index
    %c0_47 = arith.constant 0 : index
    %212 = vector.load %arg14[%211, %c0_47] : memref<64x32xf32, #tpu.memory_space<vmem>>, vector<8x32xf32>
    tpu.vector_store %arg14[%211, %c0_47], %210 {strides = array<i32>} : memref<64x32xf32, #tpu.memory_space<vmem>>, vector<8x32xf32>,
    %c5_i32 = arith.constant 5 : i32
    %c8_i32_48 = arith.constant 8 : i32
    %213 = arith.muli %c5_i32, %c8_i32_48 : i32
    %214 = arith.index_cast %213 : i32 to index
    %c0_49 = arith.constant 0 : index
    %215 = vector.load %arg13[%214, %c0_49] : memref<64x128xf32, #tpu.memory_space<vmem>>, vector<8x128xf32>
    %cst_50 = arith.constant dense<0.000000e+00> : vector<8x128xf32>
    %216 = tpu.matmul %192, %7, %cst_50 {dimension_numbers = #tpu.dot_dimension_numbers<[1], [0], [0], [1], [0, 0, 1, 1], [], []>} : vector<8x32xf32>, vector<32x128xf32>, vector<8x128xf32> -> vector<8x128xf32>
    %217 = arith.addf %215, %216 : vector<8x128xf32>
    %218 = arith.negf %217 : vector<8x128xf32>
    %219 = math.exp %218 : vector<8x128xf32>
    %cst_51 = arith.constant 1.000000e+00 : f32
    %220 = vector.broadcast %cst_51 : f32 to vector<8x128xf32>
    %221 = arith.addf %220, %219 : vector<8x128xf32>
    %222 = arith.divf %220, %221 : vector<8x128xf32>
    %223 = math.tanh %217 : vector<8x128xf32>
    %224 = vector.extract_strided_slice %222 {offsets = [0, 0], sizes = [8, 32], strides = [1, 1]} : vector<8x128xf32> to vector<8x32xf32>
    %225 = vector.extract_strided_slice %222 {offsets = [0, 32], sizes = [8, 32], strides = [1, 1]} : vector<8x128xf32> to vector<8x32xf32>
    %226 = vector.extract_strided_slice %222 {offsets = [0, 96], sizes = [8, 32], strides = [1, 1]} : vector<8x128xf32> to vector<8x32xf32>
    %227 = vector.extract_strided_slice %223 {offsets = [0, 64], sizes = [8, 32], strides = [1, 1]} : vector<8x128xf32> to vector<8x32xf32>
    %228 = arith.mulf %225, %190 : vector<8x32xf32>
    %229 = arith.mulf %224, %227 : vector<8x32xf32>
    %230 = arith.addf %228, %229 : vector<8x32xf32>
    %231 = math.tanh %230 : vector<8x32xf32>
    %232 = arith.mulf %226, %231 : vector<8x32xf32>
    %233 = tpu.concatenate %232, %210 in 1 : vector<8x32xf32>, vector<8x32xf32> -> vector<8x64xf32>
    %cst_52 = arith.constant dense<0.000000e+00> : vector<8x128xf32>
    %234 = tpu.matmul %233, %8, %cst_52 {dimension_numbers = #tpu.dot_dimension_numbers<[1], [0], [0], [1], [0, 0, 1, 1], [], []>} : vector<8x64xf32>, vector<64x128xf32>, vector<8x128xf32> -> vector<8x128xf32>
    %235 = arith.addf %234, %11 : vector<8x128xf32>
    %236 = arith.negf %235 : vector<8x128xf32>
    %237 = math.exp %236 : vector<8x128xf32>
    %cst_53 = arith.constant 1.000000e+00 : f32
    %238 = vector.broadcast %cst_53 : f32 to vector<8x128xf32>
    %239 = arith.addf %238, %237 : vector<8x128xf32>
    %240 = arith.divf %238, %239 : vector<8x128xf32>
    %241 = math.tanh %235 : vector<8x128xf32>
    %242 = vector.extract_strided_slice %240 {offsets = [0, 0], sizes = [8, 32], strides = [1, 1]} : vector<8x128xf32> to vector<8x32xf32>
    %243 = vector.extract_strided_slice %240 {offsets = [0, 32], sizes = [8, 32], strides = [1, 1]} : vector<8x128xf32> to vector<8x32xf32>
    %244 = vector.extract_strided_slice %240 {offsets = [0, 96], sizes = [8, 32], strides = [1, 1]} : vector<8x128xf32> to vector<8x32xf32>
    %245 = vector.extract_strided_slice %241 {offsets = [0, 64], sizes = [8, 32], strides = [1, 1]} : vector<8x128xf32> to vector<8x32xf32>
    %246 = arith.mulf %243, %208 : vector<8x32xf32>
    %247 = arith.mulf %242, %245 : vector<8x32xf32>
    %248 = arith.addf %246, %247 : vector<8x32xf32>
    %249 = math.tanh %248 : vector<8x32xf32>
    %250 = arith.mulf %244, %249 : vector<8x32xf32>
    %251 = arith.index_cast %213 : i32 to index
    %c0_54 = arith.constant 0 : index
    %252 = vector.load %arg14[%251, %c0_54] : memref<64x32xf32, #tpu.memory_space<vmem>>, vector<8x32xf32>
    tpu.vector_store %arg14[%251, %c0_54], %250 {strides = array<i32>} : memref<64x32xf32, #tpu.memory_space<vmem>>, vector<8x32xf32>,
    %c6_i32 = arith.constant 6 : i32
    %c8_i32_55 = arith.constant 8 : i32
    %253 = arith.muli %c6_i32, %c8_i32_55 : i32
    %254 = arith.index_cast %253 : i32 to index
    %c0_56 = arith.constant 0 : index
    %255 = vector.load %arg13[%254, %c0_56] : memref<64x128xf32, #tpu.memory_space<vmem>>, vector<8x128xf32>
    %cst_57 = arith.constant dense<0.000000e+00> : vector<8x128xf32>
    %256 = tpu.matmul %232, %7, %cst_57 {dimension_numbers = #tpu.dot_dimension_numbers<[1], [0], [0], [1], [0, 0, 1, 1], [], []>} : vector<8x32xf32>, vector<32x128xf32>, vector<8x128xf32> -> vector<8x128xf32>
    %257 = arith.addf %255, %256 : vector<8x128xf32>
    %258 = arith.negf %257 : vector<8x128xf32>
    %259 = math.exp %258 : vector<8x128xf32>
    %cst_58 = arith.constant 1.000000e+00 : f32
    %260 = vector.broadcast %cst_58 : f32 to vector<8x128xf32>
    %261 = arith.addf %260, %259 : vector<8x128xf32>
    %262 = arith.divf %260, %261 : vector<8x128xf32>
    %263 = math.tanh %257 : vector<8x128xf32>
    %264 = vector.extract_strided_slice %262 {offsets = [0, 0], sizes = [8, 32], strides = [1, 1]} : vector<8x128xf32> to vector<8x32xf32>
    %265 = vector.extract_strided_slice %262 {offsets = [0, 32], sizes = [8, 32], strides = [1, 1]} : vector<8x128xf32> to vector<8x32xf32>
    %266 = vector.extract_strided_slice %262 {offsets = [0, 96], sizes = [8, 32], strides = [1, 1]} : vector<8x128xf32> to vector<8x32xf32>
    %267 = vector.extract_strided_slice %263 {offsets = [0, 64], sizes = [8, 32], strides = [1, 1]} : vector<8x128xf32> to vector<8x32xf32>
    %268 = arith.mulf %265, %230 : vector<8x32xf32>
    %269 = arith.mulf %264, %267 : vector<8x32xf32>
    %270 = arith.addf %268, %269 : vector<8x32xf32>
    %271 = math.tanh %270 : vector<8x32xf32>
    %272 = arith.mulf %266, %271 : vector<8x32xf32>
    %273 = tpu.concatenate %272, %250 in 1 : vector<8x32xf32>, vector<8x32xf32> -> vector<8x64xf32>
    %cst_59 = arith.constant dense<0.000000e+00> : vector<8x128xf32>
    %274 = tpu.matmul %273, %8, %cst_59 {dimension_numbers = #tpu.dot_dimension_numbers<[1], [0], [0], [1], [0, 0, 1, 1], [], []>} : vector<8x64xf32>, vector<64x128xf32>, vector<8x128xf32> -> vector<8x128xf32>
    %275 = arith.addf %274, %11 : vector<8x128xf32>
    %276 = arith.negf %275 : vector<8x128xf32>
    %277 = math.exp %276 : vector<8x128xf32>
    %cst_60 = arith.constant 1.000000e+00 : f32
    %278 = vector.broadcast %cst_60 : f32 to vector<8x128xf32>
    %279 = arith.addf %278, %277 : vector<8x128xf32>
    %280 = arith.divf %278, %279 : vector<8x128xf32>
    %281 = math.tanh %275 : vector<8x128xf32>
    %282 = vector.extract_strided_slice %280 {offsets = [0, 0], sizes = [8, 32], strides = [1, 1]} : vector<8x128xf32> to vector<8x32xf32>
    %283 = vector.extract_strided_slice %280 {offsets = [0, 32], sizes = [8, 32], strides = [1, 1]} : vector<8x128xf32> to vector<8x32xf32>
    %284 = vector.extract_strided_slice %280 {offsets = [0, 96], sizes = [8, 32], strides = [1, 1]} : vector<8x128xf32> to vector<8x32xf32>
    %285 = vector.extract_strided_slice %281 {offsets = [0, 64], sizes = [8, 32], strides = [1, 1]} : vector<8x128xf32> to vector<8x32xf32>
    %286 = arith.mulf %283, %248 : vector<8x32xf32>
    %287 = arith.mulf %282, %285 : vector<8x32xf32>
    %288 = arith.addf %286, %287 : vector<8x32xf32>
    %289 = math.tanh %288 : vector<8x32xf32>
    %290 = arith.mulf %284, %289 : vector<8x32xf32>
    %291 = arith.index_cast %253 : i32 to index
    %c0_61 = arith.constant 0 : index
    %292 = vector.load %arg14[%291, %c0_61] : memref<64x32xf32, #tpu.memory_space<vmem>>, vector<8x32xf32>
    tpu.vector_store %arg14[%291, %c0_61], %290 {strides = array<i32>} : memref<64x32xf32, #tpu.memory_space<vmem>>, vector<8x32xf32>,
    %c7_i32 = arith.constant 7 : i32
    %c8_i32_62 = arith.constant 8 : i32
    %293 = arith.muli %c7_i32, %c8_i32_62 : i32
    %294 = arith.index_cast %293 : i32 to index
    %c0_63 = arith.constant 0 : index
    %295 = vector.load %arg13[%294, %c0_63] : memref<64x128xf32, #tpu.memory_space<vmem>>, vector<8x128xf32>
    %cst_64 = arith.constant dense<0.000000e+00> : vector<8x128xf32>
    %296 = tpu.matmul %272, %7, %cst_64 {dimension_numbers = #tpu.dot_dimension_numbers<[1], [0], [0], [1], [0, 0, 1, 1], [], []>} : vector<8x32xf32>, vector<32x128xf32>, vector<8x128xf32> -> vector<8x128xf32>
    %297 = arith.addf %295, %296 : vector<8x128xf32>
    %298 = arith.negf %297 : vector<8x128xf32>
    %299 = math.exp %298 : vector<8x128xf32>
    %cst_65 = arith.constant 1.000000e+00 : f32
    %300 = vector.broadcast %cst_65 : f32 to vector<8x128xf32>
    %301 = arith.addf %300, %299 : vector<8x128xf32>
    %302 = arith.divf %300, %301 : vector<8x128xf32>
    %303 = math.tanh %297 : vector<8x128xf32>
    %304 = vector.extract_strided_slice %302 {offsets = [0, 0], sizes = [8, 32], strides = [1, 1]} : vector<8x128xf32> to vector<8x32xf32>
    %305 = vector.extract_strided_slice %302 {offsets = [0, 32], sizes = [8, 32], strides = [1, 1]} : vector<8x128xf32> to vector<8x32xf32>
    %306 = vector.extract_strided_slice %302 {offsets = [0, 96], sizes = [8, 32], strides = [1, 1]} : vector<8x128xf32> to vector<8x32xf32>
    %307 = vector.extract_strided_slice %303 {offsets = [0, 64], sizes = [8, 32], strides = [1, 1]} : vector<8x128xf32> to vector<8x32xf32>
    %308 = arith.mulf %305, %270 : vector<8x32xf32>
    %309 = arith.mulf %304, %307 : vector<8x32xf32>
    %310 = arith.addf %308, %309 : vector<8x32xf32>
    %311 = math.tanh %310 : vector<8x32xf32>
    %312 = arith.mulf %306, %311 : vector<8x32xf32>
    %313 = tpu.concatenate %312, %290 in 1 : vector<8x32xf32>, vector<8x32xf32> -> vector<8x64xf32>
    %cst_66 = arith.constant dense<0.000000e+00> : vector<8x128xf32>
    %314 = tpu.matmul %313, %8, %cst_66 {dimension_numbers = #tpu.dot_dimension_numbers<[1], [0], [0], [1], [0, 0, 1, 1], [], []>} : vector<8x64xf32>, vector<64x128xf32>, vector<8x128xf32> -> vector<8x128xf32>
    %315 = arith.addf %314, %11 : vector<8x128xf32>
    %316 = arith.negf %315 : vector<8x128xf32>
    %317 = math.exp %316 : vector<8x128xf32>
    %cst_67 = arith.constant 1.000000e+00 : f32
    %318 = vector.broadcast %cst_67 : f32 to vector<8x128xf32>
    %319 = arith.addf %318, %317 : vector<8x128xf32>
    %320 = arith.divf %318, %319 : vector<8x128xf32>
    %321 = math.tanh %315 : vector<8x128xf32>
    %322 = vector.extract_strided_slice %320 {offsets = [0, 0], sizes = [8, 32], strides = [1, 1]} : vector<8x128xf32> to vector<8x32xf32>
    %323 = vector.extract_strided_slice %320 {offsets = [0, 32], sizes = [8, 32], strides = [1, 1]} : vector<8x128xf32> to vector<8x32xf32>
    %324 = vector.extract_strided_slice %320 {offsets = [0, 96], sizes = [8, 32], strides = [1, 1]} : vector<8x128xf32> to vector<8x32xf32>
    %325 = vector.extract_strided_slice %321 {offsets = [0, 64], sizes = [8, 32], strides = [1, 1]} : vector<8x128xf32> to vector<8x32xf32>
    %326 = arith.mulf %323, %288 : vector<8x32xf32>
    %327 = arith.mulf %322, %325 : vector<8x32xf32>
    %328 = arith.addf %326, %327 : vector<8x32xf32>
    %329 = math.tanh %328 : vector<8x32xf32>
    %330 = arith.mulf %324, %329 : vector<8x32xf32>
    %331 = arith.index_cast %293 : i32 to index
    %c0_68 = arith.constant 0 : index
    %332 = vector.load %arg14[%331, %c0_68] : memref<64x32xf32, #tpu.memory_space<vmem>>, vector<8x32xf32>
    tpu.vector_store %arg14[%331, %c0_68], %330 {strides = array<i32>} : memref<64x32xf32, #tpu.memory_space<vmem>>, vector<8x32xf32>,
    %c8_i32_69 = arith.constant 8 : i32
    %c0_70 = arith.constant 0 : index
    %c0_71 = arith.constant 0 : index
    %333 = vector.load %arg14[%c0_70, %c0_71] : memref<64x32xf32, #tpu.memory_space<vmem>>, vector<64x32xf32>
    %c0_72 = arith.constant 0 : index
    %c0_73 = arith.constant 0 : index
    %334 = vector.load %arg8[%c0_72, %c0_73] : memref<32x16xf32, #tpu.memory_space<vmem>>, vector<32x16xf32>
    %cst_74 = arith.constant dense<0.000000e+00> : vector<64x16xf32>
    %335 = tpu.matmul %333, %334, %cst_74 {dimension_numbers = #tpu.dot_dimension_numbers<[1], [0], [0], [1], [0, 0, 1, 1], [], []>} : vector<64x32xf32>, vector<32x16xf32>, vector<64x16xf32> -> vector<64x16xf32>
    %c0_75 = arith.constant 0 : index
    %c0_76 = arith.constant 0 : index
    %336 = vector.load %arg9[%c0_75, %c0_76] : memref<1x16xf32, #tpu.memory_space<vmem>>, vector<1x16xf32>
    %337 = vector.broadcast %336 : vector<1x16xf32> to vector<64x16xf32>
    %338 = arith.addf %335, %337 : vector<64x16xf32>
    %c0_77 = arith.constant 0 : index
    %c0_78 = arith.constant 0 : index
    %339 = vector.load %arg2[%c0_77, %c0_78] : memref<64x16xf32, #tpu.memory_space<vmem>>, vector<64x16xf32>
    %c0_79 = arith.constant 0 : index
    %c0_80 = arith.constant 0 : index
    %340 = vector.load %arg10[%c0_79, %c0_80] : memref<16x32xf32, #tpu.memory_space<vmem>>, vector<16x32xf32>
    %cst_81 = arith.constant dense<0.000000e+00> : vector<64x32xf32>
    %341 = tpu.matmul %339, %340, %cst_81 {dimension_numbers = #tpu.dot_dimension_numbers<[1], [0], [0], [1], [0, 0, 1, 1], [], []>} : vector<64x16xf32>, vector<16x32xf32>, vector<64x32xf32> -> vector<64x32xf32>
    %c0_82 = arith.constant 0 : index
    %c0_83 = arith.constant 0 : index
    %342 = vector.load %arg11[%c0_82, %c0_83] : memref<1x32xf32, #tpu.memory_space<vmem>>, vector<1x32xf32>
    %343 = vector.broadcast %342 : vector<1x32xf32> to vector<64x32xf32>
    %344 = arith.addf %341, %343 : vector<64x32xf32>
    %345 = vector.extract_strided_slice %344 {offsets = [0, 0], sizes = [64, 16], strides = [1, 1]} : vector<64x32xf32> to vector<64x16xf32>
    %346 = vector.extract_strided_slice %344 {offsets = [0, 16], sizes = [64, 16], strides = [1, 1]} : vector<64x32xf32> to vector<64x16xf32>
    %cst_84 = arith.constant dense<0xFF800000> : vector<64xf32>
    %347 = vector.multi_reduction <maximumf>, %345, %cst_84 [1] : vector<64x16xf32> to vector<64xf32>
    %348 = vector.shape_cast %347 : vector<64xf32> to vector<64x1xf32>
    %349 = vector.broadcast %348 : vector<64x1xf32> to vector<64x16xf32>
    %350 = arith.subf %345, %349 : vector<64x16xf32>
    %351 = math.exp %350 : vector<64x16xf32>
    %cst_85 = arith.constant dense<0.000000e+00> : vector<64xf32>
    %352 = vector.multi_reduction <add>, %351, %cst_85 [1] : vector<64x16xf32> to vector<64xf32>
    %353 = vector.shape_cast %352 : vector<64xf32> to vector<64x1xf32>
    %354 = vector.broadcast %353 : vector<64x1xf32> to vector<64x16xf32>
    %355 = arith.divf %351, %354 : vector<64x16xf32>
    %356 = arith.subf %338, %346 : vector<64x16xf32>
    %357 = arith.mulf %356, %355 : vector<64x16xf32>
    %cst_86 = arith.constant dense<0.000000e+00> : vector<64xf32>
    %358 = vector.multi_reduction <add>, %357, %cst_86 [1] : vector<64x16xf32> to vector<64xf32>
    %359 = vector.shape_cast %358 : vector<64xf32> to vector<64x1xf32>
    %c0_87 = arith.constant 0 : index
    %c0_88 = arith.constant 0 : index
    %360 = vector.load %arg12[%c0_87, %c0_88] : memref<64x1xf32, #tpu.memory_space<vmem>>, vector<64x1xf32>
    tpu.vector_store %arg12[%c0_87, %c0_88], %359 {strides = array<i32>} : memref<64x1xf32, #tpu.memory_space<vmem>>, vector<64x1xf32>,
    return
  }
  func.func @transform_0(%arg0: i32) -> (i32, i32) {
    %c0_i32 = arith.constant 0 : i32
    %c0_i32_0 = arith.constant 0 : i32
    %c0_i32_1 = arith.constant 0 : i32
    return %c0_i32, %c0_i32_0 : i32, i32
  }
  func.func @transform_1(%arg0: i32) -> (i32, i32) {
    %c0_i32 = arith.constant 0 : i32
    %c0_i32_0 = arith.constant 0 : i32
    %c0_i32_1 = arith.constant 0 : i32
    return %c0_i32, %c0_i32_0 : i32, i32
  }
  func.func @transform_2(%arg0: i32) -> (i32, i32) {
    %c0_i32 = arith.constant 0 : i32
    %c0_i32_0 = arith.constant 0 : i32
    %c0_i32_1 = arith.constant 0 : i32
    return %c0_i32, %c0_i32_0 : i32, i32
  }
  func.func @transform_3(%arg0: i32) -> (i32, i32) {
    %c0_i32 = arith.constant 0 : i32
    %c0_i32_0 = arith.constant 0 : i32
    %c0_i32_1 = arith.constant 0 : i32
    return %c0_i32, %c0_i32_0 : i32, i32
  }
  func.func @transform_4(%arg0: i32) -> (i32, i32) {
    %c0_i32 = arith.constant 0 : i32
    %c0_i32_0 = arith.constant 0 : i32
    %c0_i32_1 = arith.constant 0 : i32
    return %c0_i32, %c0_i32_0 : i32, i32
  }
  func.func @transform_5(%arg0: i32) -> (i32, i32) {
    %c0_i32 = arith.constant 0 : i32
    %c0_i32_0 = arith.constant 0 : i32
    %c0_i32_1 = arith.constant 0 : i32
    return %c0_i32, %c0_i32_0 : i32, i32
  }
  func.func @transform_6(%arg0: i32) -> (i32, i32) {
    %c0_i32 = arith.constant 0 : i32
    %c0_i32_0 = arith.constant 0 : i32
    %c0_i32_1 = arith.constant 0 : i32
    return %c0_i32, %c0_i32_0 : i32, i32
  }
  func.func @transform_7(%arg0: i32) -> (i32, i32) {
    %c0_i32 = arith.constant 0 : i32
    %c0_i32_0 = arith.constant 0 : i32
    %c0_i32_1 = arith.constant 0 : i32
    return %c0_i32, %c0_i32_0 : i32, i32
  }
  func.func @transform_8(%arg0: i32) -> (i32, i32) {
    %c0_i32 = arith.constant 0 : i32
    %c0_i32_0 = arith.constant 0 : i32
    %c0_i32_1 = arith.constant 0 : i32
    return %c0_i32, %c0_i32_0 : i32, i32
  }
  func.func @transform_9(%arg0: i32) -> (i32, i32) {
    %c0_i32 = arith.constant 0 : i32
    %c0_i32_0 = arith.constant 0 : i32
    %c0_i32_1 = arith.constant 0 : i32
    return %c0_i32, %c0_i32_0 : i32, i32
  }
  func.func @transform_10(%arg0: i32) -> (i32, i32) {
    %c0_i32 = arith.constant 0 : i32
    %c0_i32_0 = arith.constant 0 : i32
    %c0_i32_1 = arith.constant 0 : i32
    return %c0_i32, %c0_i32_0 : i32, i32
  }
  func.func @transform_11(%arg0: i32) -> (i32, i32) {
    %c0_i32 = arith.constant 0 : i32
    %c0_i32_0 = arith.constant 0 : i32
    %c0_i32_1 = arith.constant 0 : i32
    return %c0_i32, %c0_i32_0 : i32, i32
  }
}

</mosaic_0001>

<bundles_post_ra>
// kernel: deepirt_forward.1
= control target key start
LH: loop header
LB: loop body
LE: loop exit
PB: predicated region body
PF: predicated region fallthrough
CT: control target
= control target key end

     0   :  { %vm55_vm0 = vcmask 130048   ;;  %v3166_v0 = vmov 0.0|0.0   ;;  %vm3167_vm1 = vmmov 0   ;;  %v3168_v4 = vmov 0.0   ;;  %s3169_s14 = smov 64   ;;  %s3876_s2 = inlined_call_operand.vmem [shape: f32[16,128], index: 2, kind: input, shape index: {}]   ;;  %s3877_s4 = inlined_call_operand.vmem [shape: f32[32,128], index: 4, kind: input, shape index: {}]   ;;  %s3878_s0 = inlined_call_operand.vmem [shape: f32[64,16], index: 0, kind: input, shape index: {}]   ;;  %s3879_s3 = inlined_call_operand.vmem [shape: f32[1,128], index: 3, kind: input, shape index: {}]   ;;  %s3880_s5 = inlined_call_operand.vmem [shape: f32[64,128], index: 5, kind: input, shape index: {}]   ;;  %s3881_s6 = inlined_call_operand.vmem [shape: f32[1,128], index: 6, kind: input, shape index: {}]   ;;  %s3882_s9 = inlined_call_operand.vmem [shape: f32[16,32], index: 9, kind: input, shape index: {}]   ;;  %s3883_s1 = inlined_call_operand.vmem [shape: f32[64,16], index: 1, kind: input, shape index: {}]   ;;  %s3884_s7 = inlined_call_operand.vmem [shape: f32[32,16], index: 7, kind: input, shape index: {}]   ;;  %s3885_s10 = inlined_call_operand.vmem [shape: f32[1,32], index: 10, kind: input, shape index: {}]   ;;  %s3886_s8 = inlined_call_operand.vmem [shape: f32[1,16], index: 8, kind: input, shape index: {}]   ;;  %s3887_s11 = inlined_call_operand.vmem [shape: f32[64,1], index: 11, kind: output, shape index: {}]  }
   0x1   :  { %2842 = vmatprep.subr.bf16.mxu1 %v3166_v0  ;;  %v46_v1 = vld [vmem:[%s3876_s2] sm:$0xff]  ;;  %v47_v2 = vld [vmem:[%s3876_s2 + $0x8] sm:$0xff]  ;;  %2570 = vmatprep.mubr.msk.f32.mxu1 %vm3167_vm1, %v3168_v4  ;;  %v195_v9 = vld [vmem:[%s3877_s4 + $0x10] sm:$0xff]  ;;  %vm213_vm2 = vcmask 261120   ;;  %vm317_vm3 = vcmask 523264   ;;  %vm2330_vm4 = vcmask 7168  }
   0x2   :  { %v193_v3 = vld [vmem:[%s3877_s4] sm:$0xff]  ;;  %v2838_v5 = vpack.c.bf16 %v47_v2, %v46_v1  ;;  %v194_v6 = vld [vmem:[%s3877_s4 + $0x8] sm:$0xff]  ;;  %v196_v10 = vld [vmem:[%s3877_s4 + $0x18] sm:$0xff] }
   0x3   :  { %v38_v7 = vld [vmem:[%s3878_s0] sm:$0xff]  ;;  %v3250_v8 = vpack.c.bf16 %v194_v6, %v193_v3  ;;  %v39_v11 = vld [vmem:[%s3878_s0 + $0x8] sm:$0xff]  ;;  %v3263_v12 = vpack.c.bf16 %v196_v10, %v195_v9  ;;  %v40_v30 = vld [vmem:[%s3878_s0 + $0x10] sm:$0xff] }
   0x4   :  { %2550 = vmatprep.mubr.msk.f32.mxu0 %vm55_vm0, %v38_v7  ;;  %2839 = vmatprep.subr.bf16.mxu0 %v2838_v5  ;;  %v3280_v13 = vld [vmem:[%s3879_s3] ss:$0 sm:$0xff]  ;;  %s3170_s3 = smov 32   ;;  %v41_v31 = vld [vmem:[%s3878_s0 + $0x18] sm:$0xff]  ;;  %v198_v34 = vld [vmem:[%s3880_s5 + $0x8] sm:$0xff] }
   0x5   :  { %2844 = vmatpush3.bf16.msra.mxu1 %v3250_v8  ;;  %2841 = vmatpush3.bf16.msra.mxu0 %v2838_v5  ;;  %v42_v32 = vld [vmem:[%s3878_s0 + $0x20] sm:$0xff]  ;;  %v199_v35 = vld [vmem:[%s3880_s5 + $0x10] sm:$0xff]  ;;  %v200_v37 = vld [vmem:[%s3880_s5 + $0x18] sm:$0xff] }
   0x6   :  { %2845 = vmatprep.subr.bf16.mxu1 %v3166_v0  ;;  %2848 = vmatprep.subr.bf16.mxu0 %v3166_v0  ;;  %v197_v33 = vld [vmem:[%s3880_s5] sm:$0xff]  ;;  %v43_v38 = vld [vmem:[%s3878_s0 + $0x28] sm:$0xff]  ;;  %v3320_v39 = vpack.c.bf16 %v200_v37, %v199_v35  ;;  %v44_v40 = vld [vmem:[%s3878_s0 + $0x30] sm:$0xff] }
   0x7   :  { %v3309_v36 = vpack.c.bf16 %v198_v34, %v197_v33  ;;  %v201_v41 = vld [vmem:[%s3880_s5 + $0x20] sm:$0xff]  ;;  %v202_v42 = vld [vmem:[%s3880_s5 + $0x28] sm:$0xff]  ;;  %v45_v43 = vld [vmem:[%s3878_s0 + $0x38] sm:$0xff] }
   0x8   :  { %2551 = vmatmul.mubr.msk.f32.vlgmr.msra.gmra.mrb[0].mxu0 %vm55_vm0, %v39_v11  ;;  %v3338_v44 = vpack.c.bf16 %v202_v42, %v201_v41  ;;  %v203_v45 = vld [vmem:[%s3880_s5 + $0x30] sm:$0xff]  ;;  %v204_v46 = vld [vmem:[%s3880_s5 + $0x38] sm:$0xff]  ;;  %v3394_v60 = vld [vmem:[%s3881_s6] ss:$0 sm:$0xff] }
   0x9   :  { %2847 = vmatpush3.bf16.msra.mxu1 %v3263_v12  ;;  %2553 = vmatprep.mubr.msk.f32.mxu0 %vm55_vm0, %v40_v30  ;;  %v3352_v48 = vpack.c.bf16 %v204_v46, %v203_v45 }
   0xa   :  { %2860 = vmatprep.subr.bf16.mxu1 %v3166_v0  ;;  %2850 = vmatpush3.bf16.msra.mxu0 %v3309_v36 }
   0xb   :  { %2851 = vmatprep.subr.bf16.mxu0 %v3166_v0 }
   0xc   :  { %2571 = vmatmul.mubr.f32.vlgmr.msra.gmra.mrb[0].mxu1 %v3168_v4  ;;  %2554 = vmatmul.mubr.msk.f32.gmra.mrb[2].mxu0 %vm55_vm0, %v41_v31 }
   0xd   :  { %2862 = vmatpush3.bf16.msra.mxu1 %v3250_v8  ;;  %2600 = vmatprep.mubr.msk.f32.mxu1 %vm3167_vm1, %v3168_v4 }
   0xe   :  { %2863 = vmatprep.subr.bf16.mxu1 %v3166_v0  ;;  %2556 = vmatprep.mubr.msk.f32.mxu0 %vm55_vm0, %v42_v32 }
   0xf   :  { %2853 = vmatpush3.bf16.msra.mxu0 %v3320_v39 }
  0x10   :  { %2557 = vmatmul.mubr.msk.f32.gmra.mrb[4].mxu0 %vm55_vm0, %v43_v38  ;;  %2854 = vmatprep.subr.bf16.mxu0 %v3166_v0 }
  0x11   :  { %2865 = vmatpush3.bf16.msra.mxu1 %v3263_v12  ;;  %2559 = vmatprep.mubr.msk.f32.mxu0 %vm55_vm0, %v44_v40 }
  0x12   :  { %2866 = vmatprep.subr.bf16.mxu1 %v3166_v0 }
  0x13   :  { %2856 = vmatpush3.bf16.msra.mxu0 %v3338_v44 }
  0x14   :  { %2560 = vmatmul.mubr.msk.f32.gmra.mrb[6].mxu0 %vm55_vm0, %v45_v43  ;;  %2857 = vmatprep.subr.bf16.mxu0 %v3166_v0 }
  0x15   :  { %2589 = vmatprep.mubr.msk.f32.mxu0 %vm3167_vm1, %v3168_v4 }
  0x17   :  { %2859 = vmatpush3.bf16.msra.mxu0 %v3352_v48 }
  0x18   :  { %2878 = vmatprep.subr.bf16.mxu0 %v3166_v0 }
  0xdb   :  { %v3282_v14 = vpop.f32.mrb[0].mxu0 }
  0xdc   :  { %v146_v15 = vpop.f32.mrb[1].mxu0  ;;  %v152_v59 = vadd.f32 %v3282_v14, %v3280_v13 }
  0xdd   :  { %v147_v16 = vadd.f32 %v3280_v13, %v146_v15 }
  0xdf   :  { %v283_v17 = vpop.f32.mrb[0].mxu1  ;;  %v3358_v51 = vpop.f32.mrb[2].mxu0 }
  0xe0   :  { %v287_v18 = vadd.f32 %v283_v17, %v147_v16  ;;  %v2572_v19 = vpop.f32.mrb[1].mxu1  ;;  %v3360_v52 = vpop.f32.mrb[3].mxu0 }
  0xe1   :  { %v157_v38 = vadd.f32 %v3280_v13, %v3360_v52 }
  0xe2   :  { %3006 = vtanh.f32 %v287_v18  ;;  %v2353_v21 = vmul.f32 -1.442695, %v287_v18 }
  0xe3   :  { %v3362_v53 = vpop.f32.mrb[4].mxu0 }
  0xe4   :  { %3008 = vpow2.f32 %v2353_v21  ;;  %v3364_v54 = vpop.f32.mrb[5].mxu0 }
  0xe7   :  { %v3366_v55 = vpop.f32.mrb[6].mxu0 }
  0xe8   :  { %v3368_v56 = vpop.f32.mrb[7].mxu0 }
  0xec   :  { %v3007_v20 = vpop.eup %3006 }
  0xed   :  { %297 = vrot.lane.b32.xlu0 %v3007_v20, %s3169_s14 }
  0xee   :  { %v3009_v22 = vpop.eup %3008 }
  0xef   :  { %v291_v23 = vadd.f32 1.0, %v3009_v22 }
  0xf1   :  { %3010 = vrcp.f32 %v291_v23 }
  0xfb   :  { %v3011_v24 = vpop.eup %3010 }
  0xfc   :  { %v295_v27 = vmul.f32 0.0, %v3011_v24 }
 0x15f   :  { %v298_v25 = vpop.permute.xlu0 %297 }
 0x160   :  { %v300_v26 = vmul.f32 %v3011_v24, %v298_v25 }
 0x162   :  { %302 = vrot.lane.b32.xlu0 %v300_v26, %s3170_s3 }
 0x1d4   :  { %v303_v28 = vpop.permute.xlu0 %302 }
 0x1d5   :  { %v3287_v29 = vadd.f32 %v303_v28, %v295_v27 }
 0x1d7   :  { %3012 = vtanh.f32 %v3287_v29 }
 0x1e1   :  { %v3013_v47 = vpop.eup %3012 }
 0x1e2   :  { %308 = vrot.lane.b32.xlu1 %v3013_v47, %s3169_s14 }
 0x254   :  { %v309_v49 = vpop.permute.xlu1 %308 }
 0x255   :  { %v311_v50 = vmul.f32 %v3011_v24, %v309_v49 }
 0x257   :  { %313 = vrot.lane.b32.xlu1 %v311_v50, %s3170_s3 }
 0x2c9   :  { %v314_v57 = vpop.permute.xlu1 %313 }
 0x2ca   :  { %v316_v58 = vsel %vm213_vm2, %v314_v57, 0.0  ;;  %2601 = vmatmul.mubr.msk.f32.vlgmr.msra.gmra.mrb[2].mxu1 %vm213_vm2, %v314_v57 }
 0x2cb   :  { %2590 = vmatmul.mubr.msk.f32.vlgmr.msra.gmra.mrb[8].mxu0 %vm317_vm3, %v316_v58  ;;  %2868 = vmatpush3.bf16.msra.mxu1 %v3309_v36 }
 0x2cc   :  { %2869 = vmatprep.subr.bf16.mxu1 %v3166_v0  ;;  %2880 = vmatpush3.bf16.msra.mxu0 %v3250_v8 }
 0x2cd   :  { %2881 = vmatprep.subr.bf16.mxu0 %v3166_v0  ;;  %2630 = vmatprep.mubr.msk.f32.mxu0 %vm3167_vm1, %v3168_v4 }
 0x2ce   :  { %2619 = vmatprep.mubr.msk.f32.mxu1 %vm3167_vm1, %v3168_v4 }
 0x2cf   :  { %2871 = vmatpush3.bf16.msra.mxu1 %v3320_v39 }
 0x2d0   :  { %2872 = vmatprep.subr.bf16.mxu1 %v3166_v0  ;;  %2883 = vmatpush3.bf16.msra.mxu0 %v3263_v12 }
 0x2d1   :  { %2884 = vmatprep.subr.bf16.mxu0 %v3166_v0 }
 0x2d3   :  { %2874 = vmatpush3.bf16.msra.mxu1 %v3338_v44 }
 0x2d4   :  { %2875 = vmatprep.subr.bf16.mxu1 %v3166_v0 }
 0x2d7   :  { %2877 = vmatpush3.bf16.msra.mxu1 %v3352_v48 }
 0x2d8   :  { %2896 = vmatprep.subr.bf16.mxu1 %v3166_v0 }
 0x39d   :  { %v489_v61 = vpop.f32.mrb[2].mxu1 }
 0x39e   :  { %v493_v62 = vadd.f32 %v489_v61, %v152_v59  ;;  %v387_v63 = vpop.f32.mrb[8].mxu0  ;;  %v2602_v1 = vpop.f32.mrb[3].mxu1 }
 0x39f   :  { %v388_v2 = vadd.f32 %v3394_v60, %v387_v63  ;;  %v2591_v3 = vpop.f32.mrb[9].mxu0 }
 0x3a0   :  { %3014 = vtanh.f32 %v493_v62  ;;  %v2357_v7 = vmul.f32 -1.442695, %v493_v62 }
 0x3a1   :  { %3016 = vtanh.f32 %v388_v2  ;;  %v2355_v9 = vmul.f32 -1.442695, %v388_v2 }
 0x3a2   :  { %3018 = vpow2.f32 %v2357_v7 }
 0x3a3   :  { %3020 = vpow2.f32 %v2355_v9 }
 0x3aa   :  { %v3015_v5 = vpop.eup %3014 }
 0x3ab   :  { %v3017_v6 = vpop.eup %3016  ;;  %503 = vrot.lane.b32.xlu1 %v3015_v5, %s3169_s14 }
 0x3ac   :  { %400 = vrot.lane.b32.xlu0 %v3017_v6, %s3169_s14  ;;  %v3019_v10 = vpop.eup %3018 }
 0x3ad   :  { %v3021_v11 = vpop.eup %3020  ;;  %v497_v14 = vadd.f32 1.0, %v3019_v10 }
 0x3ae   :  { %v394_v15 = vadd.f32 1.0, %v3021_v11 }
 0x3af   :  { %3022 = vrcp.f32 %v497_v14 }
 0x3b0   :  { %3024 = vrcp.f32 %v394_v15 }
 0x3b9   :  { %v3023_v16 = vpop.eup %3022 }
 0x3ba   :  { %v3025_v18 = vpop.eup %3024  ;;  %v501_v22 = vmul.f32 %v3023_v16, %v3287_v29 }
 0x3bb   :  { %v398_v24 = vmul.f32 0.0, %v3025_v18 }
 0x41d   :  { %v504_v17 = vpop.permute.xlu1 %503 }
 0x41e   :  { %v506_v19 = vmul.f32 %v3023_v16, %v504_v17  ;;  %v401_v20 = vpop.permute.xlu0 %400 }
 0x41f   :  { %v403_v21 = vmul.f32 %v3025_v18, %v401_v20 }
 0x420   :  { %508 = vrot.lane.b32.xlu1 %v506_v19, %s3170_s3 }
 0x421   :  { %405 = vrot.lane.b32.xlu0 %v403_v21, %s3170_s3 }
 0x492   :  { %v509_v23 = vpop.permute.xlu1 %508 }
 0x493   :  { %v3402_v25 = vadd.f32 %v509_v23, %v501_v22  ;;  %v406_v26 = vpop.permute.xlu0 %405 }
 0x494   :  { %v3404_v27 = vadd.f32 %v406_v26, %v398_v24  ;;  %v162_v24 = vadd.f32 %v3358_v51, %v3280_v13 }
 0x495   :  { %3026 = vtanh.f32 %v3402_v25 }
 0x496   :  { %3028 = vtanh.f32 %v3404_v27 }
 0x49f   :  { %v3027_v28 = vpop.eup %3026 }
 0x4a0   :  { %v3029_v30 = vpop.eup %3028  ;;  %514 = vrot.lane.b32.xlu1 %v3027_v28, %s3169_s14 }
 0x4a1   :  { %411 = vrot.lane.b32.xlu0 %v3029_v30, %s3169_s14 }
 0x512   :  { %v515_v31 = vpop.permute.xlu1 %514 }
 0x513   :  { %v517_v32 = vmul.f32 %v3023_v16, %v515_v31  ;;  %v412_v29 = vpop.permute.xlu0 %411 }
 0x514   :  { %v3410_v33 = vmul.f32 %v3025_v18, %v412_v29 }
 0x515   :  { %519 = vrot.lane.b32.xlu0 %v517_v32, %s3170_s3 }
 0x516   :  { %522 = vrot.lane.b32.xlu1 %v3410_v33, %s3169_s14 }
 0x587   :  { %v520_v34 = vpop.permute.xlu0 %519 }
 0x588   :  { %v523_v35 = vpop.permute.xlu1 %522  ;;  %2631 = vmatmul.mubr.msk.f32.vlgmr.msra.gmra.mrb[10].mxu0 %vm213_vm2, %v520_v34 }
 0x589   :  { %v525_v37 = vsel %vm213_vm2, %v520_v34, %v523_v35  ;;  %2886 = vmatpush3.bf16.msra.mxu0 %v3309_v36  ;;  %2649 = vmatprep.mubr.msk.f32.mxu0 %vm3167_vm1, %v3168_v4 }
 0x58a   :  { %2620 = vmatmul.mubr.msk.f32.vlgmr.msra.gmra.mrb[4].mxu1 %vm317_vm3, %v525_v37  ;;  %2887 = vmatprep.subr.bf16.mxu0 %v3166_v0 }
 0x58b   :  { %2898 = vmatpush3.bf16.msra.mxu1 %v3250_v8  ;;  %2660 = vmatprep.mubr.msk.f32.mxu1 %vm3167_vm1, %v3168_v4 }
 0x58c   :  { %2899 = vmatprep.subr.bf16.mxu1 %v3166_v0 }
 0x58d   :  { %2889 = vmatpush3.bf16.msra.mxu0 %v3320_v39 }
 0x58e   :  { %2890 = vmatprep.subr.bf16.mxu0 %v3166_v0 }
 0x58f   :  { %2901 = vmatpush3.bf16.msra.mxu1 %v3263_v12 }
 0x590   :  { %2902 = vmatprep.subr.bf16.mxu1 %v3166_v0 }
 0x591   :  { %2892 = vmatpush3.bf16.msra.mxu0 %v3338_v44 }
 0x592   :  { %2893 = vmatprep.subr.bf16.mxu0 %v3166_v0 }
 0x595   :  { %2895 = vmatpush3.bf16.msra.mxu0 %v3352_v48 }
 0x596   :  { %2914 = vmatprep.subr.bf16.mxu0 %v3166_v0 }
 0x65b   :  { %v697_v40 = vpop.f32.mrb[10].mxu0 }
 0x65c   :  { %v701_v41 = vadd.f32 %v697_v40, %v157_v38  ;;  %v2632_v42 = vpop.f32.mrb[11].mxu0 }
 0x65d   :  { %v595_v43 = vpop.f32.mrb[4].mxu1 }
 0x65e   :  { %3030 = vtanh.f32 %v701_v41  ;;  %v596_v45 = vadd.f32 %v3394_v60, %v595_v43  ;;  %v2621_v46 = vpop.f32.mrb[5].mxu1  ;;  %v2361_v50 = vmul.f32 -1.442695, %v701_v41 }
 0x660   :  { %3032 = vtanh.f32 %v596_v45  ;;  %v2359_v57 = vmul.f32 -1.442695, %v596_v45 }
 0x661   :  { %3034 = vpow2.f32 %v2361_v50 }
 0x662   :  { %3036 = vpow2.f32 %v2359_v57 }
 0x668   :  { %v3031_v47 = vpop.eup %3030 }
 0x669   :  { %711 = vrot.lane.b32.xlu1 %v3031_v47, %s3169_s14 }
 0x66a   :  { %v3033_v49 = vpop.eup %3032 }
 0x66b   :  { %608 = vrot.lane.b32.xlu0 %v3033_v49, %s3169_s14  ;;  %v3035_v52 = vpop.eup %3034 }
 0x66c   :  { %v3037_v58 = vpop.eup %3036  ;;  %v705_v59 = vadd.f32 1.0, %v3035_v52 }
 0x66d   :  { %v602_v61 = vadd.f32 1.0, %v3037_v58 }
 0x66e   :  { %3038 = vrcp.f32 %v705_v59 }
 0x66f   :  { %3040 = vrcp.f32 %v602_v61 }
 0x678   :  { %v3039_v62 = vpop.eup %3038 }
 0x679   :  { %v3041_v2 = vpop.eup %3040  ;;  %v709_v6 = vmul.f32 %v3039_v62, %v3402_v25 }
 0x67a   :  { %v606_v10 = vmul.f32 %v3041_v2, %v3404_v27 }
 0x6db   :  { %v712_v63 = vpop.permute.xlu1 %711 }
 0x6dc   :  { %v714_v1 = vmul.f32 %v3039_v62, %v712_v63 }
 0x6dd   :  { %v609_v3 = vpop.permute.xlu0 %608 }
 0x6de   :  { %716 = vrot.lane.b32.xlu1 %v714_v1, %s3170_s3  ;;  %v611_v5 = vmul.f32 %v3041_v2, %v609_v3 }
 0x6e0   :  { %613 = vrot.lane.b32.xlu0 %v611_v5, %s3170_s3 }
 0x750   :  { %v717_v7 = vpop.permute.xlu1 %716 }
 0x751   :  { %v3442_v9 = vadd.f32 %v717_v7, %v709_v6 }
 0x752   :  { %v614_v11 = vpop.permute.xlu0 %613 }
 0x753   :  { %3042 = vtanh.f32 %v3442_v9  ;;  %v3446_v14 = vadd.f32 %v614_v11, %v606_v10 }
 0x755   :  { %3044 = vtanh.f32 %v3446_v14 }
 0x75d   :  { %v3043_v15 = vpop.eup %3042 }
 0x75e   :  { %722 = vrot.lane.b32.xlu1 %v3043_v15, %s3169_s14 }
 0x75f   :  { %v3045_v16 = vpop.eup %3044 }
 0x760   :  { %619 = vrot.lane.b32.xlu0 %v3045_v16, %s3169_s14 }
 0x7d0   :  { %v723_v17 = vpop.permute.xlu1 %722 }
 0x7d1   :  { %v725_v18 = vmul.f32 %v3039_v62, %v723_v17 }
 0x7d2   :  { %v620_v19 = vpop.permute.xlu0 %619 }
 0x7d3   :  { %727 = vrot.lane.b32.xlu0 %v725_v18, %s3170_s3  ;;  %v3452_v20 = vmul.f32 %v3041_v2, %v620_v19 }
 0x7d5   :  { %730 = vrot.lane.b32.xlu1 %v3452_v20, %s3169_s14 }
 0x845   :  { %v728_v21 = vpop.permute.xlu0 %727 }
 0x846   :  { %2661 = vmatmul.mubr.msk.f32.vlgmr.msra.gmra.mrb[6].mxu1 %vm213_vm2, %v728_v21 }
 0x847   :  { %2904 = vmatpush3.bf16.msra.mxu1 %v3309_v36  ;;  %2679 = vmatprep.mubr.msk.f32.mxu1 %vm3167_vm1, %v3168_v4  ;;  %v731_v22 = vpop.permute.xlu1 %730 }
 0x848   :  { %2905 = vmatprep.subr.bf16.mxu1 %v3166_v0  ;;  %v733_v23 = vsel %vm213_vm2, %v728_v21, %v731_v22 }
 0x849   :  { %2650 = vmatmul.mubr.msk.f32.vlgmr.msra.gmra.mrb[12].mxu0 %vm317_vm3, %v733_v23 }
 0x84a   :  { %2916 = vmatpush3.bf16.msra.mxu0 %v3250_v8  ;;  %2690 = vmatprep.mubr.msk.f32.mxu0 %vm3167_vm1, %v3168_v4 }
 0x84b   :  { %2907 = vmatpush3.bf16.msra.mxu1 %v3320_v39  ;;  %2917 = vmatprep.subr.bf16.mxu0 %v3166_v0 }
 0x84c   :  { %2908 = vmatprep.subr.bf16.mxu1 %v3166_v0 }
 0x84e   :  { %2919 = vmatpush3.bf16.msra.mxu0 %v3263_v12 }
 0x84f   :  { %2910 = vmatpush3.bf16.msra.mxu1 %v3338_v44  ;;  %2920 = vmatprep.subr.bf16.mxu0 %v3166_v0 }
 0x850   :  { %2911 = vmatprep.subr.bf16.mxu1 %v3166_v0 }
 0x853   :  { %2913 = vmatpush3.bf16.msra.mxu1 %v3352_v48 }
 0x854   :  { %2932 = vmatprep.subr.bf16.mxu1 %v3166_v0 }
 0x919   :  { %v905_v25 = vpop.f32.mrb[6].mxu1 }
 0x91a   :  { %v909_v26 = vadd.f32 %v905_v25, %v162_v24  ;;  %v2662_v27 = vpop.f32.mrb[7].mxu1 }
 0x91c   :  { %3046 = vtanh.f32 %v909_v26  ;;  %v803_v28 = vpop.f32.mrb[12].mxu0  ;;  %v2365_v34 = vmul.f32 -1.442695, %v909_v26 }
 0x91d   :  { %v804_v30 = vadd.f32 %v3394_v60, %v803_v28  ;;  %v2651_v31 = vpop.f32.mrb[13].mxu0 }
 0x91f   :  { %3048 = vtanh.f32 %v804_v30  ;;  %v2363_v35 = vmul.f32 -1.442695, %v804_v30 }
 0x920   :  { %3050 = vpow2.f32 %v2365_v34 }
 0x921   :  { %3052 = vpow2.f32 %v2363_v35 }
 0x926   :  { %v3047_v32 = vpop.eup %3046 }
 0x927   :  { %919 = vrot.lane.b32.xlu1 %v3047_v32, %s3169_s14 }
 0x929   :  { %v3049_v29 = vpop.eup %3048 }
 0x92a   :  { %816 = vrot.lane.b32.xlu0 %v3049_v29, %s3169_s14  ;;  %v3051_v51 = vpop.eup %3050 }
 0x92b   :  { %v913_v37 = vadd.f32 1.0, %v3051_v51  ;;  %v3053_v38 = vpop.eup %3052 }
 0x92c   :  { %v810_v40 = vadd.f32 1.0, %v3053_v38 }
 0x92d   :  { %3054 = vrcp.f32 %v913_v37 }
 0x92e   :  { %3056 = vrcp.f32 %v810_v40 }
 0x937   :  { %v3055_v41 = vpop.eup %3054 }
 0x938   :  { %v3057_v45 = vpop.eup %3056  ;;  %v917_v49 = vmul.f32 %v3055_v41, %v3442_v9  ;;  %v167_v9 = vadd.f32 %v3280_v13, %v3364_v54 }
 0x939   :  { %v814_v52 = vmul.f32 %v3057_v45, %v3446_v14 }
 0x999   :  { %v920_v42 = vpop.permute.xlu1 %919 }
 0x99a   :  { %v922_v43 = vmul.f32 %v3055_v41, %v920_v42 }
 0x99c   :  { %924 = vrot.lane.b32.xlu1 %v922_v43, %s3170_s3  ;;  %v817_v46 = vpop.permute.xlu0 %816 }
 0x99d   :  { %v819_v47 = vmul.f32 %v3057_v45, %v817_v46 }
 0x99f   :  { %821 = vrot.lane.b32.xlu0 %v819_v47, %s3170_s3 }
 0xa0e   :  { %v925_v50 = vpop.permute.xlu1 %924 }
 0xa0f   :  { %v3483_v57 = vadd.f32 %v925_v50, %v917_v49 }
 0xa11   :  { %3058 = vtanh.f32 %v3483_v57  ;;  %v822_v58 = vpop.permute.xlu0 %821 }
 0xa12   :  { %v3487_v59 = vadd.f32 %v822_v58, %v814_v52 }
 0xa14   :  { %3060 = vtanh.f32 %v3487_v59 }
 0xa1b   :  { %v3059_v61 = vpop.eup %3058 }
 0xa1c   :  { %930 = vrot.lane.b32.xlu1 %v3059_v61, %s3169_s14 }
 0xa1e   :  { %v3061_v62 = vpop.eup %3060 }
 0xa1f   :  { %827 = vrot.lane.b32.xlu0 %v3061_v62, %s3169_s14 }
 0xa8e   :  { %v931_v63 = vpop.permute.xlu1 %930 }
 0xa8f   :  { %v933_v1 = vmul.f32 %v3055_v41, %v931_v63 }
 0xa91   :  { %935 = vrot.lane.b32.xlu0 %v933_v1, %s3170_s3  ;;  %v828_v2 = vpop.permute.xlu0 %827 }
 0xa92   :  { %v3493_v3 = vmul.f32 %v3057_v45, %v828_v2 }
 0xa94   :  { %938 = vrot.lane.b32.xlu1 %v3493_v3, %s3169_s14 }
 0xb03   :  { %v936_v5 = vpop.permute.xlu0 %935 }
 0xb04   :  { %2691 = vmatmul.mubr.msk.f32.vlgmr.msra.gmra.mrb[14].mxu0 %vm213_vm2, %v936_v5 }
 0xb05   :  { %2922 = vmatpush3.bf16.msra.mxu0 %v3309_v36  ;;  %2709 = vmatprep.mubr.msk.f32.mxu0 %vm3167_vm1, %v3168_v4 }
 0xb06   :  { %2923 = vmatprep.subr.bf16.mxu0 %v3166_v0  ;;  %v939_v6 = vpop.permute.xlu1 %938 }
 0xb07   :  { %v941_v7 = vsel %vm213_vm2, %v936_v5, %v939_v6 }
 0xb08   :  { %2680 = vmatmul.mubr.msk.f32.vlgmr.msra.gmra.mrb[8].mxu1 %vm317_vm3, %v941_v7 }
 0xb09   :  { %2925 = vmatpush3.bf16.msra.mxu0 %v3320_v39  ;;  %2934 = vmatpush3.bf16.msra.mxu1 %v3250_v8 }
 0xb0a   :  { %2926 = vmatprep.subr.bf16.mxu0 %v3166_v0  ;;  %2935 = vmatprep.subr.bf16.mxu1 %v3166_v0 }
 0xb0b   :  { %2720 = vmatprep.mubr.msk.f32.mxu1 %vm3167_vm1, %v3168_v4 }
 0xb0d   :  { %2928 = vmatpush3.bf16.msra.mxu0 %v3338_v44  ;;  %2937 = vmatpush3.bf16.msra.mxu1 %v3263_v12 }
 0xb0e   :  { %2929 = vmatprep.subr.bf16.mxu0 %v3166_v0  ;;  %2938 = vmatprep.subr.bf16.mxu1 %v3166_v0 }
 0xb11   :  { %2931 = vmatpush3.bf16.msra.mxu0 %v3352_v48 }
 0xb12   :  { %2950 = vmatprep.subr.bf16.mxu0 %v3166_v0 }
 0xbd7   :  { %v1113_v10 = vpop.f32.mrb[14].mxu0 }
 0xbd8   :  { %v1117_v11 = vadd.f32 %v1113_v10, %v167_v9  ;;  %v2692_v14 = vpop.f32.mrb[15].mxu0 }
 0xbda   :  { %3062 = vtanh.f32 %v1117_v11  ;;  %v2369_v21 = vmul.f32 -1.442695, %v1117_v11 }
 0xbdb   :  { %v1011_v15 = vpop.f32.mrb[8].mxu1 }
 0xbdc   :  { %v1012_v16 = vadd.f32 %v3394_v60, %v1011_v15  ;;  %v2681_v17 = vpop.f32.mrb[9].mxu1 }
 0xbde   :  { %3064 = vtanh.f32 %v1012_v16  ;;  %v2367_v22 = vmul.f32 -1.442695, %v1012_v16 }
 0xbdf   :  { %3066 = vpow2.f32 %v2369_v21 }
 0xbe0   :  { %3068 = vpow2.f32 %v2367_v22 }
 0xbe4   :  { %v3063_v18 = vpop.eup %3062 }
 0xbe5   :  { %1127 = vrot.lane.b32.xlu1 %v3063_v18, %s3169_s14 }
 0xbe8   :  { %v3065_v19 = vpop.eup %3064 }
 0xbe9   :  { %1024 = vrot.lane.b32.xlu0 %v3065_v19, %s3169_s14  ;;  %v3067_v54 = vpop.eup %3066 }
 0xbea   :  { %v1121_v23 = vadd.f32 1.0, %v3067_v54  ;;  %v3069_v24 = vpop.eup %3068 }
 0xbeb   :  { %v1018_v25 = vadd.f32 1.0, %v3069_v24 }
 0xbec   :  { %3070 = vrcp.f32 %v1121_v23 }
 0xbed   :  { %3072 = vrcp.f32 %v1018_v25 }
 0xbf6   :  { %v3071_v26 = vpop.eup %3070 }
 0xbf7   :  { %v3073_v30 = vpop.eup %3072  ;;  %v1125_v29 = vmul.f32 %v3071_v26, %v3483_v57  ;;  %v172_v57 = vadd.f32 %v3362_v53, %v3280_v13 }
 0xbf8   :  { %v1022_v51 = vmul.f32 %v3073_v30, %v3487_v59 }
 0xc57   :  { %v1128_v27 = vpop.permute.xlu1 %1127 }
 0xc58   :  { %v1130_v28 = vmul.f32 %v3071_v26, %v1128_v27 }
 0xc5a   :  { %1132 = vrot.lane.b32.xlu1 %v1130_v28, %s3170_s3 }
 0xc5b   :  { %v1025_v31 = vpop.permute.xlu0 %1024 }
 0xc5c   :  { %v1027_v32 = vmul.f32 %v3073_v30, %v1025_v31 }
 0xc5e   :  { %1029 = vrot.lane.b32.xlu0 %v1027_v32, %s3170_s3 }
 0xccc   :  { %v1133_v34 = vpop.permute.xlu1 %1132 }
 0xccd   :  { %v3524_v35 = vadd.f32 %v1133_v34, %v1125_v29 }
 0xccf   :  { %3074 = vtanh.f32 %v3524_v35 }
 0xcd0   :  { %v1030_v37 = vpop.permute.xlu0 %1029 }
 0xcd1   :  { %v3528_v38 = vadd.f32 %v1030_v37, %v1022_v51 }
 0xcd3   :  { %3076 = vtanh.f32 %v3528_v38 }
 0xcd9   :  { %v3075_v40 = vpop.eup %3074 }
 0xcda   :  { %1138 = vrot.lane.b32.xlu1 %v3075_v40, %s3169_s14 }
 0xcdd   :  { %v3077_v41 = vpop.eup %3076 }
 0xcde   :  { %1035 = vrot.lane.b32.xlu0 %v3077_v41, %s3169_s14 }
 0xd4c   :  { %v1139_v42 = vpop.permute.xlu1 %1138 }
 0xd4d   :  { %v1141_v43 = vmul.f32 %v3071_v26, %v1139_v42 }
 0xd4f   :  { %1143 = vrot.lane.b32.xlu0 %v1141_v43, %s3170_s3 }
 0xd50   :  { %v1036_v45 = vpop.permute.xlu0 %1035 }
 0xd51   :  { %v3534_v46 = vmul.f32 %v3073_v30, %v1036_v45 }
 0xd53   :  { %1146 = vrot.lane.b32.xlu1 %v3534_v46, %s3169_s14 }
 0xdc1   :  { %v1144_v47 = vpop.permute.xlu0 %1143 }
 0xdc2   :  { %2721 = vmatmul.mubr.msk.f32.vlgmr.msra.gmra.mrb[10].mxu1 %vm213_vm2, %v1144_v47 }
 0xdc3   :  { %2940 = vmatpush3.bf16.msra.mxu1 %v3309_v36  ;;  %2739 = vmatprep.mubr.msk.f32.mxu1 %vm3167_vm1, %v3168_v4 }
 0xdc4   :  { %2941 = vmatprep.subr.bf16.mxu1 %v3166_v0 }
 0xdc5   :  { %v1147_v49 = vpop.permute.xlu1 %1146 }
 0xdc6   :  { %v1149_v50 = vsel %vm213_vm2, %v1144_v47, %v1147_v49 }
 0xdc7   :  { %2943 = vmatpush3.bf16.msra.mxu1 %v3320_v39  ;;  %2710 = vmatmul.mubr.msk.f32.vlgmr.msra.gmra.mrb[16].mxu0 %vm317_vm3, %v1149_v50 }
 0xdc8   :  { %2944 = vmatprep.subr.bf16.mxu1 %v3166_v0  ;;  %2952 = vmatpush3.bf16.msra.mxu0 %v3250_v8 }
 0xdc9   :  { %2750 = vmatprep.mubr.msk.f32.mxu0 %vm3167_vm1, %v3168_v4  ;;  %2953 = vmatprep.subr.bf16.mxu0 %v3166_v0 }
 0xdcb   :  { %2946 = vmatpush3.bf16.msra.mxu1 %v3338_v44 }
 0xdcc   :  { %2947 = vmatprep.subr.bf16.mxu1 %v3166_v0  ;;  %2955 = vmatpush3.bf16.msra.mxu0 %v3263_v12 }
 0xdcd   :  { %2956 = vmatprep.subr.bf16.mxu0 %v3166_v0 }
 0xdcf   :  { %2949 = vmatpush3.bf16.msra.mxu1 %v3352_v48 }
 0xdd0   :  { %2968 = vmatprep.subr.bf16.mxu1 %v3166_v0 }
 0xe95   :  { %v1321_v52 = vpop.f32.mrb[10].mxu1 }
 0xe96   :  { %v1325_v58 = vadd.f32 %v1321_v52, %v172_v57  ;;  %v2722_v59 = vpop.f32.mrb[11].mxu1 }
 0xe98   :  { %3078 = vtanh.f32 %v1325_v58  ;;  %v2373_v5 = vmul.f32 -1.442695, %v1325_v58 }
 0xe9a   :  { %v1219_v61 = vpop.f32.mrb[16].mxu0 }
 0xe9b   :  { %v1220_v62 = vadd.f32 %v3394_v60, %v1219_v61  ;;  %v2711_v63 = vpop.f32.mrb[17].mxu0 }
 0xe9d   :  { %3080 = vtanh.f32 %v1220_v62  ;;  %v2371_v6 = vmul.f32 -1.442695, %v1220_v62 }
 0xe9e   :  { %3082 = vpow2.f32 %v2373_v5 }
 0xe9f   :  { %3084 = vpow2.f32 %v2371_v6 }
 0xea2   :  { %v3079_v1 = vpop.eup %3078 }
 0xea3   :  { %1335 = vrot.lane.b32.xlu1 %v3079_v1, %s3169_s14 }
 0xea7   :  { %v3081_v2 = vpop.eup %3080 }
 0xea8   :  { %1232 = vrot.lane.b32.xlu0 %v3081_v2, %s3169_s14  ;;  %v3083_v53 = vpop.eup %3082 }
 0xea9   :  { %v1329_v7 = vadd.f32 1.0, %v3083_v53  ;;  %v3085_v9 = vpop.eup %3084 }
 0xeaa   :  { %v1226_v10 = vadd.f32 1.0, %v3085_v9 }
 0xeab   :  { %3086 = vrcp.f32 %v1329_v7 }
 0xeac   :  { %3088 = vrcp.f32 %v1226_v10 }
 0xeb5   :  { %v3087_v11 = vpop.eup %3086 }
 0xeb6   :  { %v3089_v16 = vpop.eup %3088  ;;  %v1333_v19 = vmul.f32 %v3087_v11, %v3524_v35  ;;  %v177_v35 = vadd.f32 %v3280_v13, %v3368_v56 }
 0xeb7   :  { %v1230_v54 = vmul.f32 %v3089_v16, %v3528_v38 }
 0xf15   :  { %v1336_v14 = vpop.permute.xlu1 %1335 }
 0xf16   :  { %v1338_v15 = vmul.f32 %v3087_v11, %v1336_v14 }
 0xf18   :  { %1340 = vrot.lane.b32.xlu1 %v1338_v15, %s3170_s3 }
 0xf1a   :  { %v1233_v17 = vpop.permute.xlu0 %1232 }
 0xf1b   :  { %v1235_v18 = vmul.f32 %v3089_v16, %v1233_v17 }
 0xf1d   :  { %1237 = vrot.lane.b32.xlu0 %v1235_v18, %s3170_s3 }
 0xf8a   :  { %v1341_v21 = vpop.permute.xlu1 %1340 }
 0xf8b   :  { %v3565_v22 = vadd.f32 %v1341_v21, %v1333_v19 }
 0xf8d   :  { %3090 = vtanh.f32 %v3565_v22 }
 0xf8f   :  { %v1238_v23 = vpop.permute.xlu0 %1237 }
 0xf90   :  { %v3569_v24 = vadd.f32 %v1238_v23, %v1230_v54 }
 0xf92   :  { %3092 = vtanh.f32 %v3569_v24 }
 0xf97   :  { %v3091_v25 = vpop.eup %3090 }
 0xf98   :  { %1346 = vrot.lane.b32.xlu1 %v3091_v25, %s3169_s14 }
 0xf9c   :  { %v3093_v26 = vpop.eup %3092 }
 0xf9d   :  { %1243 = vrot.lane.b32.xlu0 %v3093_v26, %s3169_s14 }
0x100a   :  { %v1347_v27 = vpop.permute.xlu1 %1346 }
0x100b   :  { %v1349_v28 = vmul.f32 %v3087_v11, %v1347_v27 }
0x100d   :  { %1351 = vrot.lane.b32.xlu0 %v1349_v28, %s3170_s3 }
0x100f   :  { %v1244_v30 = vpop.permute.xlu0 %1243 }
0x1010   :  { %v3575_v31 = vmul.f32 %v3089_v16, %v1244_v30 }
0x1012   :  { %1354 = vrot.lane.b32.xlu1 %v3575_v31, %s3169_s14 }
0x107f   :  { %v1352_v32 = vpop.permute.xlu0 %1351 }
0x1080   :  { %2751 = vmatmul.mubr.msk.f32.vlgmr.msra.gmra.mrb[18].mxu0 %vm213_vm2, %v1352_v32 }
0x1081   :  { %2958 = vmatpush3.bf16.msra.mxu0 %v3309_v36  ;;  %2769 = vmatprep.mubr.msk.f32.mxu0 %vm3167_vm1, %v3168_v4 }
0x1082   :  { %2959 = vmatprep.subr.bf16.mxu0 %v3166_v0 }
0x1084   :  { %v1355_v29 = vpop.permute.xlu1 %1354 }
0x1085   :  { %2961 = vmatpush3.bf16.msra.mxu0 %v3320_v39  ;;  %v1357_v34 = vsel %vm213_vm2, %v1352_v32, %v1355_v29 }
0x1086   :  { %2962 = vmatprep.subr.bf16.mxu0 %v3166_v0  ;;  %2740 = vmatmul.mubr.msk.f32.vlgmr.msra.gmra.mrb[12].mxu1 %vm317_vm3, %v1357_v34 }
0x1087   :  { %2970 = vmatpush3.bf16.msra.mxu1 %v3250_v8  ;;  %2780 = vmatprep.mubr.msk.f32.mxu1 %vm3167_vm1, %v3168_v4 }
0x1088   :  { %2971 = vmatprep.subr.bf16.mxu1 %v3166_v0 }
0x1089   :  { %2964 = vmatpush3.bf16.msra.mxu0 %v3338_v44 }
0x108a   :  { %2965 = vmatprep.subr.bf16.mxu0 %v3166_v0 }
0x108b   :  { %2973 = vmatpush3.bf16.msra.mxu1 %v3263_v12 }
0x108c   :  { %2974 = vmatprep.subr.bf16.mxu1 %v3166_v0 }
0x108d   :  { %2967 = vmatpush3.bf16.msra.mxu0 %v3352_v48 }
0x1153   :  { %v1529_v51 = vpop.f32.mrb[18].mxu0 }
0x1154   :  { %v1533_v8 = vadd.f32 %v1529_v51, %v177_v35  ;;  %v2752_v37 = vpop.f32.mrb[19].mxu0 }
0x1156   :  { %3094 = vtanh.f32 %v1533_v8  ;;  %v2377_v43 = vmul.f32 -1.442695, %v1533_v8 }
0x1159   :  { %v1427_v38 = vpop.f32.mrb[12].mxu1 }
0x115a   :  { %v1428_v40 = vadd.f32 %v3394_v60, %v1427_v38  ;;  %v2741_v41 = vpop.f32.mrb[13].mxu1 }
0x115c   :  { %3096 = vtanh.f32 %v1428_v40  ;;  %v2375_v45 = vmul.f32 -1.442695, %v1428_v40 }
0x115d   :  { %3098 = vpow2.f32 %v2377_v43 }
0x115e   :  { %3100 = vpow2.f32 %v2375_v45 }
0x1160   :  { %v3095_v42 = vpop.eup %3094 }
0x1161   :  { %1543 = vrot.lane.b32.xlu1 %v3095_v42, %s3169_s14 }
0x1166   :  { %v3097_v12 = vpop.eup %3096 }
0x1167   :  { %1440 = vrot.lane.b32.xlu0 %v3097_v12, %s3169_s14  ;;  %v3099_v56 = vpop.eup %3098 }
0x1168   :  { %v1537_v47 = vadd.f32 1.0, %v3099_v56  ;;  %v3101_v49 = vpop.eup %3100 }
0x1169   :  { %v1434_v50 = vadd.f32 1.0, %v3101_v49 }
0x116a   :  { %3102 = vrcp.f32 %v1537_v47 }
0x116b   :  { %3104 = vrcp.f32 %v1434_v50 }
0x1174   :  { %v3103_v57 = vpop.eup %3102 }
0x1175   :  { %v3105_v59 = vpop.eup %3104  ;;  %v1541_v63 = vmul.f32 %v3103_v57, %v3565_v22 }
0x1176   :  { %v1438_v5 = vmul.f32 %v3105_v59, %v3569_v24 }
0x11d3   :  { %v1544_v52 = vpop.permute.xlu1 %1543 }
0x11d4   :  { %v1546_v58 = vmul.f32 %v3103_v57, %v1544_v52 }
0x11d6   :  { %1548 = vrot.lane.b32.xlu1 %v1546_v58, %s3170_s3 }
0x11d9   :  { %v1441_v61 = vpop.permute.xlu0 %1440 }
0x11da   :  { %v1443_v62 = vmul.f32 %v3105_v59, %v1441_v61 }
0x11dc   :  { %1445 = vrot.lane.b32.xlu0 %v1443_v62, %s3170_s3 }
0x1248   :  { %v1549_v1 = vpop.permute.xlu1 %1548 }
0x1249   :  { %v1551_v2 = vadd.f32 %v1549_v1, %v1541_v63 }
0x124b   :  { %3106 = vtanh.f32 %v1551_v2 }
0x124e   :  { %v1446_v6 = vpop.permute.xlu0 %1445 }
0x124f   :  { %v1448_v53 = vadd.f32 %v1446_v6, %v1438_v5  ;;  %v2033_v5 = vld [vmem:[%s3882_s9 + $0x8] sm:$0xff]  ;;  %v2026_v6 = vld [vmem:[%s3883_s1 + $0x10] sm:$0xff] }
0x1251   :  { %3108 = vtanh.f32 %v1448_v53 }
0x1255   :  { %v3107_v7 = vpop.eup %3106 }
0x1256   :  { %1554 = vrot.lane.b32.xlu1 %v3107_v7, %s3169_s14 }
0x125b   :  { %v3109_v9 = vpop.eup %3108 }
0x125c   :  { %1451 = vrot.lane.b32.xlu0 %v3109_v9, %s3169_s14 }
0x12c8   :  { %v1555_v10 = vpop.permute.xlu1 %1554 }
0x12c9   :  { %v1557_v11 = vmul.f32 %v3103_v57, %v1555_v10 }
0x12cb   :  { %1559 = vrot.lane.b32.xlu0 %v1557_v11, %s3170_s3  ;;  %v1884_v11 = vld [vmem:[%s3884_s7] sm:$0xff] }
0x12ce   :  { %v1452_v14 = vpop.permute.xlu0 %1451 }
0x12cf   :  { %v3609_v15 = vmul.f32 %v3105_v59, %v1452_v14  ;;  %v1885_v14 = vld [vmem:[%s3884_s7 + $0x8] sm:$0xff] }
0x12d1   :  { %1562 = vrot.lane.b32.xlu1 %v3609_v15, %s3169_s14 }
0x133d   :  { %v1560_v16 = vpop.permute.xlu0 %1559 }
0x133e   :  { %2781 = vmatmul.mubr.msk.f32.vlgmr.msra.gmra.mrb[14].mxu1 %vm213_vm2, %v1560_v16 }
0x133f   :  { %2976 = vmatpush3.bf16.msra.mxu1 %v3309_v36  ;;  %2799 = vmatprep.mubr.msk.f32.mxu1 %vm3167_vm1, %v3168_v4  ;;  %v182_v4 = vadd.f32 %v3366_v55, %v3280_v13 }
0x1340   :  { %2977 = vmatprep.subr.bf16.mxu1 %v3166_v0 }
0x1343   :  { %2979 = vmatpush3.bf16.msra.mxu1 %v3320_v39  ;;  %v1563_v17 = vpop.permute.xlu1 %1562 }
0x1344   :  { %2980 = vmatprep.subr.bf16.mxu1 %v3166_v0  ;;  %v1565_v18 = vsel %vm213_vm2, %v1560_v16, %v1563_v17  ;;  %v2986_v16 = vpack.c.bf16 %v1885_v14, %v1884_v11 }
0x1345   :  { %2770 = vmatmul.mubr.msk.f32.vlgmr.msra.gmra.mrb[20].mxu0 %vm317_vm3, %v1565_v18  ;;  %v1886_v18 = vld [vmem:[%s3884_s7 + $0x10] sm:$0xff] }
0x1346   :  { %2987 = vmatprep.subr.bf16.mxu0 %v2986_v16 }
0x1347   :  { %2982 = vmatpush3.bf16.msra.mxu1 %v3338_v44  ;;  %2989 = vmatpush3.bf16.msra.mxu0 %v2986_v16 }
0x1348   :  { %2983 = vmatprep.subr.bf16.mxu1 %v3166_v0 }
0x134b   :  { %2985 = vmatpush3.bf16.msra.mxu1 %v3352_v48 }
0x1411   :  { %v1737_v36 = vpop.f32.mrb[14].mxu1 }
0x1412   :  { %v1741_v19 = vadd.f32 %v1737_v36, %v182_v4  ;;  %v2782_v21 = vpop.f32.mrb[15].mxu1  ;;  %v1887_v4 = vld [vmem:[%s3884_s7 + $0x18] sm:$0xff] }
0x1413   :  { %v2990_v36 = vpack.c.bf16 %v1887_v4, %v1886_v18 }
0x1414   :  { %3110 = vtanh.f32 %v1741_v19  ;;  %v2381_v0 = vmul.f32 -1.442695, %v1741_v19 }
0x1415   :  { %2991 = vmatprep.subr.bf16.mxu0 %v2990_v36 }
0x1416   :  { %2993 = vmatpush3.bf16.msra.mxu0 %v2990_v36 }
0x1418   :  { %v1635_v39 = vpop.f32.mrb[20].mxu0 }
0x1419   :  { %v1636_v22 = vadd.f32 %v3394_v60, %v1635_v39  ;;  %v2771_v54 = vpop.f32.mrb[21].mxu0 }
0x141b   :  { %3112 = vtanh.f32 %v1636_v22  ;;  %v2379_v48 = vmul.f32 -1.442695, %v1636_v22 }
0x141c   :  { %3114 = vpow2.f32 %v2381_v0  ;;  %v2030_v0 = vld [vmem:[%s3883_s1 + $0x30] sm:$0xff] }
0x141d   :  { %3116 = vpow2.f32 %v2379_v48  ;;  %v2031_v48 = vld [vmem:[%s3883_s1 + $0x38] sm:$0xff] }
0x141e   :  { %v3111_v23 = vpop.eup %3110 }
0x141f   :  { %1751 = vrot.lane.b32.xlu1 %v3111_v23, %s3169_s14 }
0x1425   :  { %v3113_v44 = vpop.eup %3112 }
0x1426   :  { %1648 = vrot.lane.b32.xlu0 %v3113_v44, %s3169_s14  ;;  %v3115_v13 = vpop.eup %3114 }
0x1427   :  { %v1745_v55 = vadd.f32 1.0, %v3115_v13  ;;  %v3117_v24 = vpop.eup %3116 }
0x1428   :  { %v1642_v25 = vadd.f32 1.0, %v3117_v24 }
0x1429   :  { %3118 = vrcp.f32 %v1745_v55 }
0x142a   :  { %3120 = vrcp.f32 %v1642_v25 }
0x1433   :  { %v3119_v26 = vpop.eup %3118 }
0x1434   :  { %v3121_v30 = vpop.eup %3120  ;;  %v1749_v34 = vmul.f32 %v3119_v26, %v1551_v2 }
0x1435   :  { %v1646_v8 = vmul.f32 %v3121_v30, %v1448_v53 }
0x1491   :  { %v1752_v27 = vpop.permute.xlu1 %1751 }
0x1492   :  { %v1754_v28 = vmul.f32 %v3119_v26, %v1752_v27 }
0x1494   :  { %1756 = vrot.lane.b32.xlu1 %v1754_v28, %s3170_s3 }
0x1498   :  { %v1649_v32 = vpop.permute.xlu0 %1648 }
0x1499   :  { %v1651_v29 = vmul.f32 %v3121_v30, %v1649_v32 }
0x149b   :  { %1653 = vrot.lane.b32.xlu0 %v1651_v29, %s3170_s3 }
0x1506   :  { %v1757_v35 = vpop.permute.xlu1 %1756 }
0x1507   :  { %v1759_v51 = vadd.f32 %v1757_v35, %v1749_v34 }
0x1509   :  { %3122 = vtanh.f32 %v1759_v51 }
0x150d   :  { %v1654_v37 = vpop.permute.xlu0 %1653 }
0x150e   :  { %v1656_v38 = vadd.f32 %v1654_v37, %v1646_v8 }
0x1510   :  { %3124 = vtanh.f32 %v1656_v38 }
0x1513   :  { %v3123_v40 = vpop.eup %3122 }
0x1514   :  { %1762 = vrot.lane.b32.xlu1 %v3123_v40, %s3169_s14 }
0x151a   :  { %v3125_v41 = vpop.eup %3124 }
0x151b   :  { %1659 = vrot.lane.b32.xlu0 %v3125_v41, %s3169_s14 }
0x1586   :  { %v1763_v42 = vpop.permute.xlu1 %1762 }
0x1587   :  { %v1765_v12 = vmul.f32 %v3119_v26, %v1763_v42 }
0x1589   :  { %1767 = vrot.lane.b32.xlu0 %v1765_v12, %s3170_s3 }
0x158d   :  { %v1660_v43 = vpop.permute.xlu0 %1659 }
0x158e   :  { %v1662_v45 = vmul.f32 %v3121_v30, %v1660_v43  ;;  %v2024_v43 = vld [vmem:[%s3883_s1] sm:$0xff] }
0x1590   :  { %1770 = vrot.lane.b32.xlu1 %v1662_v45, %s3169_s14 }
0x15fb   :  { %v1768_v56 = vpop.permute.xlu0 %1767 }
0x1602   :  { %v1771_v47 = vpop.permute.xlu1 %1770 }
0x1603   :  { %v1773_v49 = vsel %vm213_vm2, %v1768_v56, %v1771_v47  ;;  %v2025_v56 = vld [vmem:[%s3883_s1 + $0x8] sm:$0xff] }
0x1604   :  { %2800 = vmatmul.mubr.msk.f32.vlgmr.msra.gmra.mrb[16].mxu1 %vm317_vm3, %v1773_v49 }
0x1605   :  { %2829 = vmatprep.mubr.msk.f32.mxu1 %vm55_vm0, %v2026_v6 }
0x16d7   :  { %v1843_v50 = vpop.f32.mrb[16].mxu1 }
0x16d8   :  { %v1844_v57 = vadd.f32 %v3394_v60, %v1843_v50  ;;  %v2801_v52 = vpop.f32.mrb[17].mxu1  ;;  %v2032_v60 = vld [vmem:[%s3882_s9] sm:$0xff] }
0x16d9   :  { %v3656_v53 = vpack.c.bf16 %v2033_v5, %v2032_v60 }
0x16da   :  { %3126 = vtanh.f32 %v1844_v57  ;;  %v2383_v59 = vmul.f32 -1.442695, %v1844_v57 }
0x16db   :  { %2998 = vmatprep.subr.bf16.mxu1 %v3656_v53  ;;  %2995 = vmatprep.subr.bf16.mxu0 %v3656_v53 }
0x16dc   :  { %3128 = vpow2.f32 %v2383_v59  ;;  %2999 = vmatpush3.bf16.msra.mxu1 %v3656_v53 }
0x16e4   :  { %v3127_v58 = vpop.eup %3126 }
0x16e5   :  { %1856 = vrot.lane.b32.xlu0 %v3127_v58, %s3169_s14 }
0x16e6   :  { %v3129_v61 = vpop.eup %3128 }
0x16e7   :  { %v1850_v62 = vadd.f32 1.0, %v3129_v61 }
0x16e9   :  { %3130 = vrcp.f32 %v1850_v62 }
0x16f3   :  { %v3131_v63 = vpop.eup %3130 }
0x16f4   :  { %v1854_v7 = vmul.f32 %v3131_v63, %v1656_v38 }
0x1757   :  { %v1857_v1 = vpop.permute.xlu0 %1856 }
0x1758   :  { %v1859_v2 = vmul.f32 %v3131_v63, %v1857_v1 }
0x175a   :  { %1861 = vrot.lane.b32.xlu1 %v1859_v2, %s3170_s3 }
0x175e   :  { %416 = vrot.lane.b32.xlu1 %v3410_v33, %s3170_s3  ;;  %v2027_v33 = vld [vmem:[%s3883_s1 + $0x18] sm:$0xff] }
0x175f   :  { %2830 = vmatmul.mubr.msk.f32.vlgmr.msra.gmra.mrb[18].mxu1 %vm55_vm0, %v2027_v33 }
0x1762   :  { %832 = vrot.lane.b32.xlu1 %v3493_v3, %s3170_s3  ;;  %v2028_v3 = vld [vmem:[%s3883_s1 + $0x20] sm:$0xff] }
0x1763   :  { %2832 = vmatprep.mubr.msk.f32.mxu1 %vm55_vm0, %v2028_v3 }
0x1766   :  { %1248 = vrot.lane.b32.xlu1 %v3575_v31, %s3170_s3  ;;  %v2029_v31 = vld [vmem:[%s3883_s1 + $0x28] sm:$0xff]  ;;  %s3171_s1 = smov 112  }
0x1767   :  { %2833 = vmatmul.mubr.msk.f32.gmra.mrb[20].mxu1 %vm55_vm0, %v2029_v31 }
0x1768   :  { %2835 = vmatprep.mubr.msk.f32.mxu1 %vm55_vm0, %v2030_v0 }
0x176a   :  { %1664 = vrot.lane.b32.xlu1 %v1662_v45, %s3170_s3 }
0x176b   :  { %2836 = vmatmul.mubr.msk.f32.gmra.mrb[22].mxu1 %vm55_vm0, %v2031_v48 }
0x17cc   :  { %v1862_v9 = vpop.permute.xlu1 %1861 }
0x17cd   :  { %v1864_v10 = vadd.f32 %v1862_v9, %v1854_v7 }
0x17cf   :  { %3132 = vtanh.f32 %v1864_v10 }
0x17d0   :  { %v417_v17 = vpop.permute.xlu1 %416 }
0x17d1   :  { %419 = vst.msk [vmem:[#allocation3] sm:$0xff] %vm213_vm2, %v417_v17 }
0x17d4   :  { %v833_v19 = vpop.permute.xlu1 %832 }
0x17d5   :  { %835 = vst.msk [vmem:[#allocation3 + $0x10] sm:$0xff] %vm213_vm2, %v833_v19 }
0x17d8   :  { %v1249_v21 = vpop.permute.xlu1 %1248  ;;  %v1876_v39 = vld [vmem:[#allocation3] sm:$0xff] }
0x17d9   :  { %v3133_v22 = vpop.eup %3132  ;;  %1251 = vst.msk [vmem:[#allocation3 + $0x20] sm:$0xff] %vm213_vm2, %v1249_v21  ;;  %2810 = vmatprep.mubr.msk.f32.mxu0 %vm213_vm2, %v1876_v39 }
0x17da   :  { %1867 = vrot.lane.b32.xlu0 %v3133_v22, %s3169_s14 }
0x17dc   :  { %v1665_v54 = vpop.permute.xlu1 %1664  ;;  %v1878_v34 = vld [vmem:[#allocation3 + $0x10] sm:$0xff] }
0x17dd   :  { %1667 = vst.msk [vmem:[#allocation3 + $0x30] sm:$0xff] %vm213_vm2, %v1665_v54 }
0x17de   :  { %624 = vrot.lane.b32.xlu0 %v3452_v20, %s3170_s3  ;;  %v3710_v20 = vld [vmem:[%s3885_s10] ss:$0 sm:$0xff] }
0x17e0   :  { %v1880_v51 = vld [vmem:[#allocation3 + $0x20] sm:$0xff] }
0x17e2   :  { %1040 = vrot.lane.b32.xlu0 %v3534_v46, %s3170_s3 }
0x17e4   :  { %v1882_v37 = vld [vmem:[#allocation3 + $0x30] sm:$0xff] }
0x17e6   :  { %1456 = vrot.lane.b32.xlu0 %v3609_v15, %s3170_s3 }
0x1832   :  { %v2831_v13 = vpop.f32.mrb[18].mxu1 }
0x1833   :  { %v2141_v46 = vpop.f32.mrb[19].mxu1  ;;  %v3714_v55 = vadd.f32 %v2831_v13, %v3710_v20 }
0x1834   :  { %v3734_v38 = vadd.f32 %v3710_v20, %v2141_v46 }
0x1835   :  { %v2179_v27 = vsel %vm55_vm0, %v3714_v55, -inf }
0x1836   :  { %2180 = vmax.xlane.f32.xlu1 %v2179_v27  ;;  %v2176_v41 = vsel %vm55_vm0, %v3734_v38, -inf }
0x183a   :  { %v2834_v24 = vpop.f32.mrb[20].mxu1 }
0x183b   :  { %v3718_v25 = vadd.f32 %v2834_v24, %v3710_v20  ;;  %v2151_v26 = vpop.f32.mrb[21].mxu1 }
0x183c   :  { %v3737_v40 = vadd.f32 %v3710_v20, %v2151_v26 }
0x183d   :  { %v2185_v30 = vsel %vm55_vm0, %v3718_v25, -inf }
0x183e   :  { %2186 = vmax.xlane.f32.xlu1 %v2185_v30  ;;  %v2182_v42 = vsel %vm55_vm0, %v3737_v40, -inf  ;;  %v2837_v47 = vpop.f32.mrb[22].mxu1 }
0x183f   :  { %v2161_v49 = vpop.f32.mrb[23].mxu1  ;;  %v2167_v4 = vadd.f32 %v2837_v47, %v3710_v20  ;;  %v2384_v47 = vld [vmem:[%s3886_s8] ss:$0 sm:$0xff] }
0x1840   :  { %v2162_v17 = vadd.f32 %v3710_v20, %v2161_v49 }
0x1841   :  { %v2191_v22 = vsel %vm55_vm0, %v2167_v4, -inf }
0x1842   :  { %v2188_v21 = vsel %vm55_vm0, %v2162_v17, -inf }
0x184c   :  { %v1868_v23 = vpop.permute.xlu0 %1867 }
0x184d   :  { %v1870_v44 = vmul.f32 %v3131_v63, %v1868_v23 }
0x184f   :  { %1872 = vrot.lane.b32.xlu0 %v1870_v44, %s3170_s3 }
0x1850   :  { %v625_v15 = vpop.permute.xlu0 %624 }
0x1851   :  { %627 = vst.msk [vmem:[#allocation3 + $0x8] sm:$0xff] %vm213_vm2, %v625_v15 }
0x1854   :  { %v1041_v28 = vpop.permute.xlu0 %1040 }
0x1855   :  { %1043 = vst.msk [vmem:[#allocation3 + $0x18] sm:$0xff] %vm213_vm2, %v1041_v28 }
0x1858   :  { %v1457_v32 = vpop.permute.xlu0 %1456  ;;  %v1877_v29 = vld [vmem:[#allocation3 + $0x8] sm:$0xff] }
0x1859   :  { %1459 = vst.msk [vmem:[#allocation3 + $0x28] sm:$0xff] %vm213_vm2, %v1457_v32  ;;  %2811 = vmatmul.mubr.msk.f32.vlgmr.msra.gmra.mrb[22].mxu0 %vm213_vm2, %v1877_v29 }
0x185a   :  { %2813 = vmatprep.mubr.msk.f32.mxu0 %vm213_vm2, %v1878_v34  ;;  %2997 = vmatpush3.bf16.msra.mxu0 %v3656_v53 }
0x185c   :  { %v1879_v35 = vld [vmem:[#allocation3 + $0x18] sm:$0xff] }
0x185d   :  { %2814 = vmatmul.mubr.msk.f32.gmra.mrb[24].mxu0 %vm213_vm2, %v1879_v35 }
0x185e   :  { %2816 = vmatprep.mubr.msk.f32.mxu0 %vm213_vm2, %v1880_v51 }
0x1860   :  { %v1881_v8 = vld [vmem:[#allocation3 + $0x28] sm:$0xff] }
0x1861   :  { %2817 = vmatmul.mubr.msk.f32.gmra.mrb[26].mxu0 %vm213_vm2, %v1881_v8 }
0x1862   :  { %2819 = vmatprep.mubr.msk.f32.mxu0 %vm213_vm2, %v1882_v37 }
0x186e   :  { %2177 = vmax.xlane.f32.xlu0 %v2176_v41 }
0x1872   :  { %2183 = vmax.xlane.f32.xlu0 %v2182_v42 }
0x18c1   :  { %v1873_v12 = vpop.permute.xlu0 %1872 }
0x18c2   :  { %1875 = vst.msk [vmem:[#allocation3 + $0x38] sm:$0xff] %vm213_vm2, %v1873_v12 }
0x18c3   :  { %v2181_v63 = vpop.xlane.xlu1 %2180 }
0x18c4   :  { %v2197_v60 = vsub.f32 %v3714_v55, %v2181_v63 }
0x18c6   :  { %v2208_v33 = vmul.f32 1.442695, %v2197_v60 }
0x18c9   :  { %v1883_v45 = vld [vmem:[#allocation3 + $0x38] sm:$0xff] }
0x18ca   :  { %2820 = vmatmul.mubr.msk.f32.gmra.mrb[28].mxu0 %vm213_vm2, %v1883_v45 }
0x18cb   :  { %2826 = vmatprep.mubr.msk.f32.mxu0 %vm55_vm0, %v2024_v43  ;;  %v2187_v6 = vpop.xlane.xlu1 %2186 }
0x18cc   :  { %v2199_v3 = vsub.f32 %v3718_v25, %v2187_v6 }
0x18ce   :  { %2827 = vmatmul.mubr.msk.f32.vlgmr.msra.gmra.mrb[30].mxu0 %vm55_vm0, %v2025_v56  ;;  %v2212_v10 = vmul.f32 1.442695, %v2199_v3 }
0x18fb   :  { %v2178_v62 = vpop.xlane.xlu0 %2177 }
0x18fc   :  { %v2196_v1 = vsub.f32 %v3734_v38, %v2178_v62 }
0x18fe   :  { %v2206_v5 = vmul.f32 1.442695, %v2196_v1 }
0x18ff   :  { %v2184_v2 = vpop.xlane.xlu0 %2183 }
0x1900   :  { %v2198_v53 = vsub.f32 %v3737_v40, %v2184_v2  ;;  %3134 = vpow2.f32 %v2206_v5 }
0x1901   :  { %3136 = vpow2.f32 %v2208_v33 }
0x1902   :  { %v2210_v7 = vmul.f32 1.442695, %v2198_v53 }
0x1904   :  { %3138 = vpow2.f32 %v2210_v7 }
0x1905   :  { %3140 = vpow2.f32 %v2212_v10 }
0x190a   :  { %v3780_v39 = vpop.eup %3134 }
0x190b   :  { %v3783_v54 = vpop.eup %3136  ;;  %v2224_v23 = vsel %vm55_vm0, %v3780_v39, 0.0 }
0x190c   :  { %v2227_v0 = vsel %vm55_vm0, %v3783_v54, 0.0 }
0x190e   :  { %v3787_v44 = vpop.eup %3138 }
0x190f   :  { %v3791_v48 = vpop.eup %3140  ;;  %v2230_v13 = vsel %vm55_vm0, %v3787_v44, 0.0 }
0x192c   :  { %v3753_v50 = vpop.f32.mrb[22].mxu0 }
0x192d   :  { %v3755_v57 = vpop.f32.mrb[23].mxu0  ;;  %v1991_v1 = vadd.f32 %v3753_v50, %v2384_v47 }
0x192e   :  { %v1986_v63 = vadd.f32 %v2384_v47, %v3755_v57 }
0x1930   :  { %v3757_v52 = vpop.f32.mrb[24].mxu0 }
0x1931   :  { %v3759_v58 = vpop.f32.mrb[25].mxu0  ;;  %v2001_v3 = vadd.f32 %v3757_v52, %v2384_v47 }
0x1932   :  { %v1996_v7 = vadd.f32 %v2384_v47, %v3759_v58 }
0x1934   :  { %v3761_v59 = vpop.f32.mrb[26].mxu0 }
0x1935   :  { %v3763_v61 = vpop.f32.mrb[27].mxu0 }
0x199d   :  { %v3769_v31 = vpop.f32.mrb[28].mxu0 }
0x199e   :  { %v3771_v9 = vpop.f32.mrb[29].mxu0 }
0x19a1   :  { %v2828_v11 = vpop.f32.mrb[30].mxu0 }
0x19a2   :  { %v2137_v14 = vadd.f32 %v2828_v11, %v3710_v20  ;;  %v2131_v16 = vpop.f32.mrb[31].mxu0 }
0x19a3   :  { %v2132_v18 = vadd.f32 %v3710_v20, %v2131_v16  ;;  %v2233_v20 = vsel %vm55_vm0, %v3791_v48, 0.0 }
0x19a4   :  { %v2173_v36 = vsel %vm55_vm0, %v2137_v14, -inf }
0x19a5   :  { %2174 = vmax.xlane.f32.xlu0 %v2173_v36  ;;  %v2170_v19 = vsel %vm55_vm0, %v2132_v18, -inf }
0x19a6   :  { %2171 = vmax.xlane.f32.xlu1 %v2170_v19  ;;  %v2006_v19 = vadd.f32 %v2384_v47, %v3763_v61 }
0x19a9   :  { %2189 = vmax.xlane.f32.xlu0 %v2188_v21 }
0x19aa   :  { %2192 = vmax.xlane.f32.xlu1 %v2191_v22 }
0x19ad   :  { %2225 = vadd.xlane.f32.xlu0 %v2224_v23 }
0x19ae   :  { %2228 = vadd.xlane.f32.xlu1 %v2227_v0 }
0x19b1   :  { %2231 = vadd.xlane.f32.xlu0 %v2230_v13 }
0x19b2   :  { %2234 = vadd.xlane.f32.xlu1 %v2233_v20 }
0x1a32   :  { %v2175_v46 = vpop.xlane.xlu0 %2174 }
0x1a33   :  { %v2172_v15 = vpop.xlane.xlu1 %2171  ;;  %v2195_v37 = vsub.f32 %v2137_v14, %v2175_v46 }
0x1a34   :  { %v2194_v8 = vsub.f32 %v2132_v18, %v2172_v15 }
0x1a35   :  { %v2204_v42 = vmul.f32 1.442695, %v2195_v37 }
0x1a36   :  { %v2190_v24 = vpop.xlane.xlu0 %2189  ;;  %v2202_v41 = vmul.f32 1.442695, %v2194_v8 }
0x1a37   :  { %v2200_v26 = vsub.f32 %v2162_v17, %v2190_v24  ;;  %v2193_v27 = vpop.xlane.xlu1 %2192 }
0x1a38   :  { %v2201_v28 = vsub.f32 %v2167_v4, %v2193_v27  ;;  %v2016_v27 = vadd.f32 %v2384_v47, %v3771_v9 }
0x1a39   :  { %v2214_v30 = vmul.f32 1.442695, %v2200_v26  ;;  %v2021_v26 = vadd.f32 %v3769_v31, %v2384_v47 }
0x1a3a   :  { %v2216_v32 = vmul.f32 1.442695, %v2201_v28 }
0x1a3b   :  { %3142 = vpow2.f32 %v2214_v30 }
0x1a3c   :  { %3144 = vpow2.f32 %v2216_v32 }
0x1a3d   :  { %3146 = vpow2.f32 %v2202_v41 }
0x1a3e   :  { %3148 = vpow2.f32 %v2204_v42 }
0x1a45   :  { %v3797_v29 = vpop.eup %3142 }
0x1a46   :  { %v3799_v34 = vpop.eup %3144  ;;  %v2236_v35 = vsel %vm55_vm0, %v3797_v29, 0.0 }
0x1a47   :  { %2237 = vadd.xlane.f32.xlu0 %v2236_v35  ;;  %v2239_v51 = vsel %vm55_vm0, %v3799_v34, 0.0  ;;  %v3809_v12 = vpop.eup %3146 }
0x1a48   :  { %2240 = vadd.xlane.f32.xlu1 %v2239_v51  ;;  %v3811_v43 = vpop.eup %3148  ;;  %v2218_v45 = vsel %vm55_vm0, %v3809_v12, 0.0 }
0x1a59   :  { %2268 = vrot.lane.b32.xlu1 %v2137_v14, %s3171_s1 }
0x1a5d   :  { %2266 = vrot.lane.b32.xlu0 %v2132_v18, %s3171_s1  ;;  %2270 = vrot.lane.b32.xlu1 %v3734_v38, %s3171_s1  ;;  %v2229_v38 = vpop.xlane.xlu1 %2228 }
0x1a5e   :  { %3150 = vrcp.f32 %v2229_v38 }
0x1a61   :  { %2272 = vrot.lane.b32.xlu0 %v3714_v55, %s3171_s1  ;;  %2274 = vrot.lane.b32.xlu1 %v3737_v40, %s3171_s1  ;;  %v2221_v55 = vsel %vm55_vm0, %v3811_v43, 0.0  ;;  %v2235_v56 = vpop.xlane.xlu1 %2234 }
0x1a65   :  { %2276 = vrot.lane.b32.xlu0 %v3718_v25, %s3171_s1  ;;  %v2226_v25 = vpop.xlane.xlu0 %2225 }
0x1a66   :  { %3152 = vrcp.f32 %v2226_v25 }
0x1a67   :  { %3154 = vrcp.f32 %v2235_v56 }
0x1a68   :  { %v3151_v6 = vpop.eup %3150 }
0x1a69   :  { %v2232_v40 = vpop.xlane.xlu0 %2231  ;;  %v2249_v16 = vmul.f32 %v3151_v6, %v3783_v54 }
0x1a6a   :  { %3156 = vrcp.f32 %v2232_v40 }
0x1a70   :  { %v3153_v33 = vpop.eup %3152 }
0x1a71   :  { %v2247_v57 = vmul.f32 %v3153_v33, %v3780_v39 }
0x1a84   :  { %2219 = vadd.xlane.f32.xlu0 %v2218_v45 }
0x1a85   :  { %2222 = vadd.xlane.f32.xlu1 %v2221_v55 }
0x1a96   :  { %2278 = vrot.lane.b32.xlu1 %v2162_v17, %s3171_s1  ;;  %v3155_v17 = vpop.eup %3154 }
0x1a97   :  { %v3157_v50 = vpop.eup %3156  ;;  %v2253_v0 = vmul.f32 %v3155_v17, %v3791_v48 }
0x1a98   :  { %v2251_v54 = vmul.f32 %v3157_v50, %v3787_v44 }
0x1a9a   :  { %2280 = vrot.lane.b32.xlu0 %v2167_v4, %s3171_s1  ;;  %v2011_v4 = vadd.f32 %v3761_v59, %v2384_v47 }
0x1ad4   :  { %v2238_v49 = vpop.xlane.xlu0 %2237 }
0x1ad5   :  { %v2241_v62 = vpop.xlane.xlu1 %2240 }
0x1ad6   :  { %3158 = vrcp.f32 %v2241_v62 }
0x1ad7   :  { %3160 = vrcp.f32 %v2238_v49 }
0x1ad8   :  { %v2267_v2 = vpop.permute.xlu0 %2266 }
0x1ad9   :  { %v2290_v60 = vsub.f32 %v1986_v63, %v2267_v2  ;;  %v2269_v5 = vpop.permute.xlu1 %2268 }
0x1ada   :  { %v2291_v53 = vsub.f32 %v1991_v1, %v2269_v5 }
0x1adc   :  { %v2273_v10 = vpop.permute.xlu0 %2272 }
0x1add   :  { %v2293_v11 = vsub.f32 %v2001_v3, %v2273_v10  ;;  %v2271_v14 = vpop.permute.xlu1 %2270 }
0x1ade   :  { %v2292_v18 = vsub.f32 %v1996_v7, %v2271_v14 }
0x1adf   :  { %v2301_v36 = vmul.f32 %v2293_v11, %v2249_v16 }
0x1ae0   :  { %v2277_v21 = vpop.permute.xlu0 %2276  ;;  %v2300_v22 = vmul.f32 %v2292_v18, %v2247_v57  ;;  %v3159_v24 = vpop.eup %3158 }
0x1ae1   :  { %v2295_v52 = vsub.f32 %v2011_v4, %v2277_v21  ;;  %v2275_v23 = vpop.permute.xlu1 %2274  ;;  %v2315_v58 = vsel %vm55_vm0, %v2301_v36, 0.0  ;;  %v3161_v44 = vpop.eup %3160  ;;  %v2257_v30 = vmul.f32 %v3159_v24, %v3799_v34 }
0x1ae2   :  { %v2294_v13 = vsub.f32 %v2006_v19, %v2275_v23  ;;  %2316 = vadd.xlane.f32.xlu1 %v2315_v58  ;;  %v2312_v39 = vsel %vm55_vm0, %v2300_v22, 0.0  ;;  %v2255_v51 = vmul.f32 %v3161_v44, %v3797_v29 }
0x1ae3   :  { %2313 = vadd.xlane.f32.xlu0 %v2312_v39  ;;  %v2303_v20 = vmul.f32 %v2295_v52, %v2253_v0 }
0x1ae4   :  { %v2302_v59 = vmul.f32 %v2294_v13, %v2251_v54 }
0x1ae5   :  { %v2321_v46 = vsel %vm55_vm0, %v2303_v20, 0.0 }
0x1ae6   :  { %2322 = vadd.xlane.f32.xlu1 %v2321_v46  ;;  %v2318_v61 = vsel %vm55_vm0, %v2302_v59, 0.0 }
0x1ae7   :  { %2319 = vadd.xlane.f32.xlu0 %v2318_v61 }
0x1b11   :  { %v2220_v15 = vpop.xlane.xlu0 %2219 }
0x1b12   :  { %3162 = vrcp.f32 %v2220_v15  ;;  %v2223_v48 = vpop.xlane.xlu1 %2222 }
0x1b13   :  { %3164 = vrcp.f32 %v2223_v48 }
0x1b15   :  { %v2281_v28 = vpop.permute.xlu0 %2280 }
0x1b16   :  { %v2297_v32 = vsub.f32 %v2021_v26, %v2281_v28  ;;  %v2279_v35 = vpop.permute.xlu1 %2278 }
0x1b17   :  { %v2296_v8 = vsub.f32 %v2016_v27, %v2279_v35 }
0x1b18   :  { %v2305_v37 = vmul.f32 %v2297_v32, %v2257_v30 }
0x1b19   :  { %v2304_v41 = vmul.f32 %v2296_v8, %v2255_v51 }
0x1b1a   :  { %v2327_v40 = vsel %vm55_vm0, %v2305_v37, 0.0 }
0x1b1b   :  { %v2324_v29 = vsel %vm55_vm0, %v2304_v41, 0.0 }
0x1b1c   :  { %v3163_v42 = vpop.eup %3162 }
0x1b1d   :  { %v3165_v45 = vpop.eup %3164  ;;  %v2243_v55 = vmul.f32 %v3163_v42, %v3809_v12 }
0x1b1e   :  { %v2245_v25 = vmul.f32 %v3165_v45, %v3811_v43 }
0x1b1f   :  { %v2298_v38 = vmul.f32 %v2290_v60, %v2243_v55 }
0x1b20   :  { %v2299_v31 = vmul.f32 %v2291_v53, %v2245_v25 }
0x1b21   :  { %v2306_v9 = vsel %vm55_vm0, %v2298_v38, 0.0 }
0x1b22   :  { %2307 = vadd.xlane.f32.xlu1 %v2306_v9  ;;  %v2309_v34 = vsel %vm55_vm0, %v2299_v31, 0.0 }
0x1b23   :  { %2310 = vadd.xlane.f32.xlu0 %v2309_v34 }
0x1b26   :  { %2328 = vadd.xlane.f32.xlu1 %v2327_v40 }
0x1b27   :  { %2325 = vadd.xlane.f32.xlu0 %v2324_v29 }
0x1b6f   :  { %v2317_v56 = vpop.xlane.xlu1 %2316 }
0x1b70   :  { %2334 = vst.msk [vmem:[%s3887_s11 + $0x18] sm:$0xff] %vm2330_vm4, %v2317_v56  ;;  %v2314_v12 = vpop.xlane.xlu0 %2313 }
0x1b71   :  { %2333 = vst.msk [vmem:[%s3887_s11 + $0x10] sm:$0xff] %vm2330_vm4, %v2314_v12 }
0x1b73   :  { %v2323_v43 = vpop.xlane.xlu1 %2322 }
0x1b74   :  { %2336 = vst.msk [vmem:[%s3887_s11 + $0x28] sm:$0xff] %vm2330_vm4, %v2323_v43  ;;  %v2320_v47 = vpop.xlane.xlu0 %2319 }
0x1b75   :  { %2335 = vst.msk [vmem:[%s3887_s11 + $0x20] sm:$0xff] %vm2330_vm4, %v2320_v47 }
0x1baf   :  { %v2308_v49 = vpop.xlane.xlu1 %2307 }
0x1bb0   :  { %2331 = vst.msk [vmem:[%s3887_s11] sm:$0xff] %vm2330_vm4, %v2308_v49  ;;  %v2311_v62 = vpop.xlane.xlu0 %2310 }
0x1bb1   :  { %2332 = vst.msk [vmem:[%s3887_s11 + $0x8] sm:$0xff] %vm2330_vm4, %v2311_v62 }
0x1bb3   :  { %v2329_v63 = vpop.xlane.xlu1 %2328 }
0x1bb4   :  { %2338 = vst.msk [vmem:[%s3887_s11 + $0x38] sm:$0xff] %vm2330_vm4, %v2329_v63  ;;  %v2326_v1 = vpop.xlane.xlu0 %2325 }
0x1bb5   :  { %2337 = vst.msk [vmem:[%s3887_s11 + $0x30] sm:$0xff] %vm2330_vm4, %v2326_v1 }

</bundles_post_ra>
